<compile_context>
chip_gen: v7x
topology: tpu7x:2x2x1
jax: 0.10.0
libtpu: 0.0.40
codegen_flags: <defaults>
</compile_context>

<pallas_src>
import functools

import jax
import jax.numpy as jnp
from jax.experimental import pallas as pl
from jax.experimental.pallas import tpu as pltpu


def _round_up(x, m):
    return ((x + m - 1) // m) * m


def _act_jnp(y, act):
    if act == "relu":
        return jnp.maximum(y, 0.0)
    if act == "leaky":
        return jnp.where(y >= 0, y, 0.01 * y)
    if act == "sigmoid":
        return jax.nn.sigmoid(y)
    return y


# ----------------------------------------------------------------------------
# Pallas kernels
# ----------------------------------------------------------------------------
def _mm_kernel(a_ref, b_ref, bias_ref, o_ref, acc_ref, *, act):
    @pl.when(pl.program_id(2) == 0)
    def _():
        acc_ref[...] = jnp.zeros_like(acc_ref)

    acc_ref[...] += jnp.dot(a_ref[...], b_ref[...],
                            preferred_element_type=jnp.float32)

    @pl.when(pl.program_id(2) == pl.num_programs(2) - 1)
    def _():
        y = acc_ref[...] + bias_ref[...]
        if act == "relu":
            y = jnp.maximum(y, 0.0)
        elif act == "leaky":
            y = jnp.where(y >= 0, y, 0.01 * y)
        elif act == "sigmoid":
            y = jax.nn.sigmoid(y)
        o_ref[...] = y


@functools.lru_cache(maxsize=None)
def _matmul_fn(Mp, Kp, Np, tm, tk, tn, act):
    call = pl.pallas_call(
        functools.partial(_mm_kernel, act=act),
        out_shape=jax.ShapeDtypeStruct((Mp, Np), jnp.float32),
        grid_spec=pltpu.PrefetchScalarGridSpec(
            num_scalar_prefetch=0,
            grid=(Mp // tm, Np // tn, Kp // tk),
            in_specs=[pl.BlockSpec((tm, tk), lambda i, j, k: (i, k)),
                      pl.BlockSpec((tk, tn), lambda i, j, k: (k, j)),
                      pl.BlockSpec((1, tn), lambda i, j, k: (0, j))],
            out_specs=pl.BlockSpec((tm, tn), lambda i, j, k: (i, j)),
            scratch_shapes=[pltpu.VMEM((tm, tn), jnp.float32)]),
        compiler_params=pltpu.CompilerParams(
            dimension_semantics=("parallel", "parallel", "arbitrary")),
    )
    return jax.jit(call)


def _mm_tiles(M, K, N):
    Mp = _round_up(M, 16)               # bf16 A block: sublane multiple of 16
    tm = min(1024, Mp)
    Mp = _round_up(Mp, tm)
    Np = _round_up(N, 128)
    if Np % 512 == 0 and Mp <= 64:
        tn = 512
    elif Np % 256 == 0:
        tn = 256
    else:
        tn = 128
    if K <= 512:
        Kp = _round_up(K, 128)
        tk = Kp
    elif K <= 4096:
        tk = 512
        Kp = _round_up(K, tk)
    elif K <= 8192:
        tk = 1024
        Kp = _round_up(K, tk)
    else:
        tk = 2048
        Kp = _round_up(K, tk)
    return Mp, Kp, Np, tm, tk, tn


def pallas_matmul(a, b, bias=None, act="none"):
    """act(a @ b + bias): bf16 operands on the MXU, f32 accumulation/output."""
    M, K = a.shape
    N = b.shape[1]
    if bias is None:
        bias = jnp.zeros((N,), jnp.float32)
    # Degenerate / lane-hostile shapes: padding to the 128-lane MXU tile would
    # multiply HBM traffic by >16x for trivial FLOPs -> plain JAX.
    if N < 8 or K < 8:
        y = jnp.dot(a.astype(jnp.float32), b.astype(jnp.float32))
        return _act_jnp(y + bias.astype(jnp.float32), act)
    Mp, Kp, Np, tm, tk, tn = _mm_tiles(M, K, N)
    a_p = jnp.pad(a.astype(jnp.bfloat16), ((0, Mp - M), (0, Kp - K)))
    b_p = jnp.pad(b.astype(jnp.bfloat16), ((0, Kp - K), (0, Np - N)))
    bias_p = jnp.pad(bias.astype(jnp.float32), (0, Np - N)).reshape(1, Np)
    out = _matmul_fn(Mp, Kp, Np, tm, tk, tn, act)(a_p, b_p, bias_p)
    return out[:M, :N]


def _ssa_kernel(x_ref, s_ref, t_ref, o_ref, *, act):
    y = x_ref[...] * s_ref[...] + t_ref[...]
    if act == "relu":
        y = jnp.maximum(y, 0.0)
    elif act == "leaky":
        y = jnp.where(y >= 0, y, 0.01 * y)
    elif act == "sigmoid":
        y = jax.nn.sigmoid(y)
    o_ref[...] = y


@functools.lru_cache(maxsize=None)
def _ssa_fn(Mp, Cp, tr, act):
    call = pl.pallas_call(
        functools.partial(_ssa_kernel, act=act),
        out_shape=jax.ShapeDtypeStruct((Mp, Cp), jnp.float32),
        grid_spec=pltpu.PrefetchScalarGridSpec(
            num_scalar_prefetch=0,
            grid=(Mp // tr,),
            in_specs=[pl.BlockSpec((tr, Cp), lambda i: (i, 0)),
                      pl.BlockSpec((1, Cp), lambda i: (0, 0)),
                      pl.BlockSpec((1, Cp), lambda i: (0, 0))],
            out_specs=pl.BlockSpec((tr, Cp), lambda i: (i, 0))),
    )
    return jax.jit(call)


def scale_shift_act(x2d, scale, shift, act="none"):
    """act(x * scale + shift) with per-column (channel) scale/shift (f32 VPU)."""
    M, C = x2d.shape
    Cp = _round_up(C, 128)
    Mp = _round_up(M, 8)
    tr = min(2048, Mp)
    Mp = _round_up(Mp, tr)
    xp = jnp.pad(x2d.astype(jnp.float32), ((0, Mp - M), (0, Cp - C)))
    sp = jnp.pad(scale.astype(jnp.float32), (0, Cp - C)).reshape(1, Cp)
    tp = jnp.pad(shift.astype(jnp.float32), (0, Cp - C)).reshape(1, Cp)
    return _ssa_fn(Mp, Cp, tr, act)(xp, sp, tp)[:M, :C]


def _softmax_kernel(x_ref, o_ref):
    x = x_ref[...]
    m = jnp.max(x, axis=-1, keepdims=True)
    e = jnp.exp(x - m)
    o_ref[...] = e / jnp.sum(e, axis=-1, keepdims=True)


@functools.lru_cache(maxsize=None)
def _softmax_fn(Mp, Cp, tr):
    call = pl.pallas_call(
        _softmax_kernel,
        out_shape=jax.ShapeDtypeStruct((Mp, Cp), jnp.float32),
        grid_spec=pltpu.PrefetchScalarGridSpec(
            num_scalar_prefetch=0,
            grid=(Mp // tr,),
            in_specs=[pl.BlockSpec((tr, Cp), lambda i: (i, 0))],
            out_specs=pl.BlockSpec((tr, Cp), lambda i: (i, 0))),
    )
    return jax.jit(call)


def softmax_lastdim(x2d):
    M, C = x2d.shape
    if M < 8 or C < 128:       # degenerate bottleneck case -> plain JAX
        return jax.nn.softmax(x2d.astype(jnp.float32), axis=-1)
    Mp = _round_up(M, 8)
    Cp = _round_up(C, 128)
    tr = min(1024, Mp)
    Mp = _round_up(Mp, tr)
    xp = jnp.pad(x2d.astype(jnp.float32), ((0, Mp - M), (0, Cp - C)),
                 constant_values=-1e30)
    return _softmax_fn(Mp, Cp, tr)(xp)[:M, :C]


# ----------------------------------------------------------------------------
# Conv / norm building blocks (im2col glue + Pallas GEMM)
# ----------------------------------------------------------------------------
def conv3d(x, w, b, stride=1, padding=0, dilation=1, act="none"):
    """x: (N,Cin,D,H,W), w: (Cout,Cin,k,k,k) — PyTorch Conv3d semantics."""
    N, Cin, D, H, W = x.shape
    Cout, _, k, _, _ = w.shape
    p = padding
    xp = jnp.pad(x, ((0, 0), (0, 0), (p, p), (p, p), (p, p)))
    eff = dilation * (k - 1) + 1
    Do = (D + 2 * p - eff) // stride + 1
    Ho = (H + 2 * p - eff) // stride + 1
    Wo = (W + 2 * p - eff) // stride + 1
    patches = []
    for a in range(k):
        for bb in range(k):
            for c in range(k):
                patches.append(
                    xp[:, :,
                       a * dilation: a * dilation + stride * (Do - 1) + 1: stride,
                       bb * dilation: bb * dilation + stride * (Ho - 1) + 1: stride,
                       c * dilation: c * dilation + stride * (Wo - 1) + 1: stride])
    pat = jnp.stack(patches, axis=2)                       # (N,Cin,k^3,Do,Ho,Wo)
    pat = pat.transpose(0, 3, 4, 5, 1, 2).reshape(N * Do * Ho * Wo, Cin * k ** 3)
    wm = w.reshape(Cout, Cin * k ** 3).T                   # (Cin*k^3, Cout)
    out = pallas_matmul(pat, wm, b, act=act)               # (M, Cout)
    return out.reshape(N, Do, Ho, Wo, Cout).transpose(0, 4, 1, 2, 3)


def conv_transpose3d_2x(x, w, b, act="none"):
    """ConvTranspose3d(kernel=2, stride=2). w: (Cin,Cout,2,2,2)."""
    N, Cin, D, H, W = x.shape
    Cout = w.shape[1]
    xm = x.transpose(0, 2, 3, 4, 1).reshape(N * D * H * W, Cin)
    wm = w.reshape(Cin, Cout * 8)
    bias8 = jnp.repeat(b, 8)                               # column order cout*8+off
    y = pallas_matmul(xm, wm, bias8, act=act)              # (M, Cout*8)
    y = y.reshape(N, D, H, W, Cout, 2, 2, 2)
    y = y.transpose(0, 4, 1, 5, 2, 6, 3, 7).reshape(N, Cout, 2 * D, 2 * H, 2 * W)
    return y


def batchnorm_act(x, act="none", eps=1e-5):
    """Training-mode BatchNorm3d (gamma=1, beta=0) fused with activation."""
    N, C, D, H, W = x.shape
    x2 = x.transpose(0, 2, 3, 4, 1).reshape(-1, C)
    mean = jnp.mean(x2, axis=0)
    var = jnp.mean(jnp.square(x2 - mean), axis=0)
    scale = 1.0 / jnp.sqrt(var + eps)
    shift = -mean * scale
    y2 = scale_shift_act(x2, scale, shift, act)
    return y2.reshape(N, D, H, W, C).transpose(0, 4, 1, 2, 3)


def instancenorm_act(x, act="leaky", eps=1e-5):
    """InstanceNorm3d (affine=False) fused with activation."""
    N, C, D, H, W = x.shape
    outs = []
    for n in range(N):
        x2 = x[n].transpose(1, 2, 3, 0).reshape(-1, C)
        mean = jnp.mean(x2, axis=0)
        var = jnp.mean(jnp.square(x2 - mean), axis=0)
        scale = 1.0 / jnp.sqrt(var + eps)
        shift = -mean * scale
        outs.append(scale_shift_act(x2, scale, shift, act)
                    .reshape(D, H, W, C).transpose(3, 0, 1, 2))
    return jnp.stack(outs, axis=0)


def _interp_matrix(in_s, out_s):
    idx = jnp.arange(out_s, dtype=jnp.float32)
    if out_s > 1:
        src = idx * (in_s - 1) / (out_s - 1)
    else:
        src = jnp.zeros((out_s,), jnp.float32)
    i0 = jnp.clip(jnp.floor(src).astype(jnp.int32), 0, in_s - 1)
    i1 = jnp.clip(i0 + 1, 0, in_s - 1)
    f = src - i0.astype(jnp.float32)
    m = jnp.zeros((out_s, in_s), jnp.float32)
    m = m.at[jnp.arange(out_s), i0].add(1.0 - f)
    m = m.at[jnp.arange(out_s), i1].add(f)
    return m


def trilinear_align_corners(x, size):
    """F.interpolate(mode='trilinear', align_corners=True) — plain-JAX glue."""
    Md = _interp_matrix(x.shape[2], size[0])
    Mh = _interp_matrix(x.shape[3], size[1])
    Mw = _interp_matrix(x.shape[4], size[2])
    y = jnp.einsum("ncdhw,ad->ncahw", x, Md)
    y = jnp.einsum("ncdhw,ah->ncdaw", y, Mh)
    y = jnp.einsum("ncdhw,aw->ncdha", y, Mw)
    return y


# ----------------------------------------------------------------------------
# Parameter init (deterministic, synthetic)
# ----------------------------------------------------------------------------
def conv_init(key, cout, cin, k):
    fan_in = cin * (k ** 3)
    w = jax.random.normal(key, (cout, cin, k, k, k), jnp.float32) / jnp.sqrt(float(fan_in))
    return (w, jnp.zeros((cout,), jnp.float32))


def deconv_init(key, cin, cout, k=2):
    fan_in = cin * (k ** 3)
    w = jax.random.normal(key, (cin, cout, k, k, k), jnp.float32) / jnp.sqrt(float(fan_in))
    return (w, jnp.zeros((cout,), jnp.float32))


def ce_params(keys, c):
    cs = c // 4
    p = {}
    for name in ("p1_cr", "p2_cr", "p3_cr", "p4_cr"):
        p[name] = conv_init(next(keys), cs, c, 1)
    p["p1"] = conv_init(next(keys), cs, cs, 1)
    p["p1_dc"] = conv_init(next(keys), cs, cs, 3)
    p["p2"] = conv_init(next(keys), cs, cs, 3)
    p["p2_dc"] = conv_init(next(keys), cs, cs, 3)
    p["p3"] = conv_init(next(keys), cs, cs, 5)
    p["p3_dc"] = conv_init(next(keys), cs, cs, 3)
    p["p4"] = conv_init(next(keys), cs, cs, 7)
    p["p4_dc"] = conv_init(next(keys), cs, cs, 3)
    p["fusion"] = conv_init(next(keys), c, c, 1)
    return p


def discern_params(keys, c1, c2):
    return {
        "fus_conv": conv_init(next(keys), c1, c2, 3),
        "fus_deconv": deconv_init(next(keys), c1, c1),
        "inp_pred": deconv_init(next(keys), 1, 1),
        "out_pred": conv_init(next(keys), 1, c1, 3),
        "false_positive": ce_params(keys, c1),
        "false_negative": ce_params(keys, c1),
        "alpha": jnp.ones((1,), jnp.float32),
        "beta": jnp.ones((1,), jnp.float32),
    }


def init_idnet_params(key):
    keys = iter(jax.random.split(key, 512))
    P = {}
    P["layer0"] = conv_init(next(keys), 16, 3, 3)
    P["layer1_down"] = conv_init(next(keys), 16, 16, 2)
    P["layer1_conv"] = conv_init(next(keys), 32, 16, 3)
    # TODO(synk): ResUNet encoder stages undefined upstream; shape-compatible stand-ins.
    P["layer2"] = {"down": conv_init(next(keys), 64, 32, 2),
                   "conv": conv_init(next(keys), 64, 64, 3)}
    P["layer3"] = {"down": conv_init(next(keys), 256, 64, 2),
                   "conv": conv_init(next(keys), 256, 256, 3)}
    P["layer4"] = {"down": conv_init(next(keys), 512, 256, 2),
                   "conv": conv_init(next(keys), 512, 512, 3)}
    P["cr4"] = conv_init(next(keys), 512, 512, 3)
    P["cr3"] = conv_init(next(keys), 256, 256, 3)
    P["cr2"] = conv_init(next(keys), 64, 64, 3)
    P["cr1"] = conv_init(next(keys), 32, 32, 3)
    P["identify"] = {
        "gamma_ca": jnp.ones((1,), jnp.float32),
        "sa": {"query": conv_init(next(keys), 512 // 8, 512, 1),
               "key": conv_init(next(keys), 512 // 8, 512, 1),
               "value": conv_init(next(keys), 512, 512, 1),
               "gamma": jnp.ones((1,), jnp.float32)},
        "map_pred": conv_init(next(keys), 1, 512, 7),
    }
    P["discern3"] = discern_params(keys, 256, 512)
    P["discern2"] = discern_params(keys, 64, 256)
    P["discern1"] = discern_params(keys, 32, 64)
    return P


# ----------------------------------------------------------------------------
# Model blocks
# ----------------------------------------------------------------------------
def _cbr(wb, inp, pad=0, dil=1):
    w, b = wb
    return batchnorm_act(conv3d(inp, w, b, 1, pad, dil), "relu")


def ce_block(p, x):
    # Fuse the four 1x1 channel-reduction convs into one GEMM.  Per-channel
    # BatchNorm statistics over the fused output are identical to running the
    # four BatchNorm3d layers separately (channels do not mix).
    cr_w = jnp.concatenate([p["p1_cr"][0], p["p2_cr"][0],
                            p["p3_cr"][0], p["p4_cr"][0]], axis=0)
    cr_b = jnp.concatenate([p["p1_cr"][1], p["p2_cr"][1],
                            p["p3_cr"][1], p["p4_cr"][1]], axis=0)
    cr = batchnorm_act(conv3d(x, cr_w, cr_b, 1, 0), "relu")
    p1_in, p2_red, p3_red, p4_red = jnp.split(cr, 4, axis=1)

    p1 = _cbr(p["p1"], p1_in)
    p1_dc = _cbr(p["p1_dc"], p1, pad=1, dil=1)
    p2_in = p2_red + p1_dc
    p2 = _cbr(p["p2"], p2_in, pad=1)
    p2_dc = _cbr(p["p2_dc"], p2, pad=2, dil=2)
    p3_in = p3_red + p2_dc
    p3 = _cbr(p["p3"], p3_in, pad=2)
    p3_dc = _cbr(p["p3_dc"], p3, pad=4, dil=4)
    p4_in = p4_red + p3_dc
    p4 = _cbr(p["p4"], p4_in, pad=3)
    p4_dc = _cbr(p["p4_dc"], p4, pad=8, dil=8)
    ce = jnp.concatenate([p1_dc, p2_dc, p3_dc, p4_dc], axis=1)
    return _cbr(p["fusion"], ce)


def discern(p, x, y, last_prediction):
    up = batchnorm_act(conv3d(y, *p["fus_conv"], 1, 1), "relu")
    up = conv_transpose3d_2x(up, *p["fus_deconv"])
    lp = conv_transpose3d_2x(last_prediction, *p["inp_pred"], act="sigmoid")
    f_feature = x * lp
    b_feature = x * (1.0 - lp)
    fp = ce_block(p["false_positive"], f_feature)
    fn = ce_block(p["false_negative"], b_feature)
    refined = up - p["alpha"] * fp
    refined = batchnorm_act(refined, "relu")
    refined = refined + p["beta"] * fn
    refined = batchnorm_act(refined, "relu")
    out_pred = conv3d(refined, *p["out_pred"], 1, 1)
    return refined, out_pred


def ca_block(gamma, x):
    B, C, D, H, W = x.shape
    M = D * H * W
    q = x.reshape(B, C, M).astype(jnp.float32)
    outs = []
    for bi in range(B):
        energy = pallas_matmul(q[bi], q[bi].T)        # (C, C)
        att = softmax_lastdim(energy)
        outs.append(pallas_matmul(att, q[bi]))        # (C, M)
    out = jnp.stack(outs, 0).reshape(B, C, D, H, W)
    return gamma * out + x


def sa_block(p, x):
    B, C, D, H, W = x.shape
    M = D * H * W
    c8 = C // 8
    # Fuse the q/k/v 1x1 convs into a single GEMM over the shared input.
    w_all = jnp.concatenate([p["query"][0], p["key"][0], p["value"][0]], axis=0)
    b_all = jnp.concatenate([p["query"][1], p["key"][1], p["value"][1]], axis=0)
    qkv = conv3d(x, w_all, b_all)
    q = qkv[:, :c8].reshape(B, c8, M)
    k = qkv[:, c8:2 * c8].reshape(B, c8, M)
    v = qkv[:, 2 * c8:].reshape(B, C, M)
    outs = []
    for bi in range(B):
        energy = pallas_matmul(q[bi].T, k[bi])        # (M, M)
        att = softmax_lastdim(energy)
        outs.append(pallas_matmul(v[bi], att.T))      # (C, M)
    out = jnp.stack(outs, 0).reshape(B, C, D, H, W)
    return p["gamma"] * out + x


def identify(p, x):
    ca = ca_block(p["gamma_ca"], x)
    sa = sa_block(p["sa"], ca)
    pred = conv3d(sa, *p["map_pred"], 1, 3)
    return sa, pred


def idnet_forward(P, x_t1, x_t2, x_flair):
    x = jnp.concatenate([x_t1, x_t2, x_flair], axis=1)

    l0 = instancenorm_act(conv3d(x, *P["layer0"], 1, 1), "leaky")
    l1 = conv3d(l0, *P["layer1_down"], 2, 0)
    l1 = instancenorm_act(conv3d(l1, *P["layer1_conv"], 1, 1), "leaky")

    def enc(pe, inp):
        h = instancenorm_act(conv3d(inp, *pe["down"], 2, 0), "leaky")
        h = instancenorm_act(conv3d(h, *pe["conv"], 1, 1), "leaky")
        return h

    l2 = enc(P["layer2"], l1)
    l3 = enc(P["layer3"], l2)
    l4 = enc(P["layer4"], l3)

    cr4 = batchnorm_act(conv3d(l4, *P["cr4"], 1, 1), "relu")
    cr3 = batchnorm_act(conv3d(l3, *P["cr3"], 1, 1), "relu")
    cr2 = batchnorm_act(conv3d(l2, *P["cr2"], 1, 1), "relu")
    cr1 = batchnorm_act(conv3d(l1, *P["cr1"], 1, 1), "relu")

    att_feat, pred4 = identify(P["identify"], cr4)
    dec3, pred3 = discern(P["discern3"], cr3, att_feat, pred4)
    dec2, pred2 = discern(P["discern2"], cr2, dec3, pred3)
    dec1, pred1 = discern(P["discern1"], cr1, dec2, pred2)

    pred0 = trilinear_align_corners(pred1, x.shape[2:])

    sig = jax.nn.sigmoid
    return sig(pred4), sig(pred3), sig(pred2), sig(pred1), sig(pred0)


# ----------------------------------------------------------------------------
if __name__ == "__main__":
    key = jax.random.PRNGKey(0)
    pkey, k1, k2, k3 = jax.random.split(key, 4)
    params = init_idnet_params(pkey)

    # spatial must be divisible by 16 (four stride-2 stages); 16^3 is the
    # smallest consistent size and keeps the whole net fast to run/interpret.
    shape = (1, 1, 16, 16, 16)
    x_t1 = jax.random.normal(k1, shape, jnp.float32)
    x_t2 = jax.random.normal(k2, shape, jnp.float32)
    x_flair = jax.random.normal(k3, shape, jnp.float32)

    outs = idnet_forward(params, x_t1, x_t2, x_flair)
    outs = jax.block_until_ready(outs)

    expected_shapes = [(1, 1, 1, 1, 1), (1, 1, 2, 2, 2), (1, 1, 4, 4, 4),
                       (1, 1, 8, 8, 8), (1, 1, 16, 16, 16)]
    for o, es in zip(outs, expected_shapes):
        assert o.shape == es, (o.shape, es)
        assert bool(jnp.all(jnp.isfinite(o)))
    print("KERNEL_OK")
</pallas_src>

<mosaic_0001>
module attributes {stable_mosaic.version = 11 : i64} {
  func.func @_mm_kernel(%arg0: i32, %arg1: i32, %arg2: i32, %arg3: memref<1024x128xbf16, #tpu.memory_space<vmem>>, %arg4: memref<128x128xbf16, #tpu.memory_space<vmem>>, %arg5: memref<1x128xf32, #tpu.memory_space<vmem>>, %arg6: memref<1024x128xf32, #tpu.memory_space<vmem>>, %arg7: memref<1024x128xf32, #tpu.memory_space<vmem>>) attributes {dimension_semantics = [#tpu.dimension_semantics<parallel>, #tpu.dimension_semantics<parallel>, #tpu.dimension_semantics<arbitrary>], iteration_bounds = array<i64: 4, 1, 1>, scalar_prefetch = 0 : i64, scratch_operands = 1 : i64, tpu.core_type = #tpu.core_type<tc>, window_params = [{transform_indices = @transform_0, window_bounds = array<i64: 1024, 128>}, {transform_indices = @transform_1, window_bounds = array<i64: 128, 128>}, {transform_indices = @transform_2, window_bounds = array<i64: 1, 128>}, {transform_indices = @transform_3, window_bounds = array<i64: 1024, 128>}]} {
    %c0_i32 = arith.constant 0 : i32
    %0 = arith.cmpi eq, %arg2, %c0_i32 : i32
    %1 = arith.extui %0 : i1 to i32
    %c0_i32_0 = arith.constant 0 : i32
    %2 = arith.cmpi ne, %1, %c0_i32_0 : i32
    scf.if %2 {
      %cst_10 = arith.constant 0.000000e+00 : f32
      %12 = vector.broadcast %cst_10 : f32 to vector<1024x128xf32>
      %c0_11 = arith.constant 0 : index
      %c0_12 = arith.constant 0 : index
      %13 = vector.load %arg7[%c0_11, %c0_12] : memref<1024x128xf32, #tpu.memory_space<vmem>>, vector<1024x128xf32>
      tpu.vector_store %arg7[%c0_11, %c0_12], %12 {strides = array<i32>} : memref<1024x128xf32, #tpu.memory_space<vmem>>, vector<1024x128xf32>,
    } else {
    }
    %c0 = arith.constant 0 : index
    %c0_1 = arith.constant 0 : index
    %3 = vector.load %arg7[%c0, %c0_1] : memref<1024x128xf32, #tpu.memory_space<vmem>>, vector<1024x128xf32>
    %c0_2 = arith.constant 0 : index
    %c0_3 = arith.constant 0 : index
    %4 = vector.load %arg3[%c0_2, %c0_3] : memref<1024x128xbf16, #tpu.memory_space<vmem>>, vector<1024x128xbf16>
    %c0_4 = arith.constant 0 : index
    %c0_5 = arith.constant 0 : index
    %5 = vector.load %arg4[%c0_4, %c0_5] : memref<128x128xbf16, #tpu.memory_space<vmem>>, vector<128x128xbf16>
    %cst = arith.constant dense<0.000000e+00> : vector<1024x128xf32>
    %6 = tpu.matmul %4, %5, %cst {dimension_numbers = #tpu.dot_dimension_numbers<[1], [0], [0], [1], [0, 0, 1, 1], [], []>} : vector<1024x128xbf16>, vector<128x128xbf16>, vector<1024x128xf32> -> vector<1024x128xf32>
    %7 = arith.addf %3, %6 : vector<1024x128xf32>
    %c0_6 = arith.constant 0 : index
    %c0_7 = arith.constant 0 : index
    %8 = vector.load %arg7[%c0_6, %c0_7] : memref<1024x128xf32, #tpu.memory_space<vmem>>, vector<1024x128xf32>
    tpu.vector_store %arg7[%c0_6, %c0_7], %7 {strides = array<i32>} : memref<1024x128xf32, #tpu.memory_space<vmem>>, vector<1024x128xf32>,
    %c0_i32_8 = arith.constant 0 : i32
    %9 = arith.cmpi eq, %arg2, %c0_i32_8 : i32
    %10 = arith.extui %9 : i1 to i32
    %c0_i32_9 = arith.constant 0 : i32
    %11 = arith.cmpi ne, %10, %c0_i32_9 : i32
    scf.if %11 {
      %c0_10 = arith.constant 0 : index
      %c0_11 = arith.constant 0 : index
      %12 = vector.load %arg7[%c0_10, %c0_11] : memref<1024x128xf32, #tpu.memory_space<vmem>>, vector<1024x128xf32>
      %c0_12 = arith.constant 0 : index
      %c0_13 = arith.constant 0 : index
      %13 = vector.load %arg5[%c0_12, %c0_13] : memref<1x128xf32, #tpu.memory_space<vmem>>, vector<1x128xf32>
      %14 = vector.broadcast %13 : vector<1x128xf32> to vector<1024x128xf32>
      %15 = arith.addf %12, %14 : vector<1024x128xf32>
      %c0_14 = arith.constant 0 : index
      %c0_15 = arith.constant 0 : index
      %16 = vector.load %arg6[%c0_14, %c0_15] : memref<1024x128xf32, #tpu.memory_space<vmem>>, vector<1024x128xf32>
      tpu.vector_store %arg6[%c0_14, %c0_15], %15 {strides = array<i32>} : memref<1024x128xf32, #tpu.memory_space<vmem>>, vector<1024x128xf32>,
    } else {
    }
    return
  }
  func.func @transform_0(%arg0: i32, %arg1: i32, %arg2: i32) -> (i32, i32) {
    %c0_i32 = arith.constant 0 : i32
    return %arg0, %arg2 : i32, i32
  }
  func.func @transform_1(%arg0: i32, %arg1: i32, %arg2: i32) -> (i32, i32) {
    %c0_i32 = arith.constant 0 : i32
    return %arg2, %arg1 : i32, i32
  }
  func.func @transform_2(%arg0: i32, %arg1: i32, %arg2: i32) -> (i32, i32) {
    %c0_i32 = arith.constant 0 : i32
    %c0_i32_0 = arith.constant 0 : i32
    return %c0_i32, %arg1 : i32, i32
  }
  func.func @transform_3(%arg0: i32, %arg1: i32, %arg2: i32) -> (i32, i32) {
    %c0_i32 = arith.constant 0 : i32
    return %arg0, %arg1 : i32, i32
  }
}

</mosaic_0001>

<bundles_post_ra>
// kernel: tpu_custom_call.1
= control target key start
LH: loop header
LB: loop body
LE: loop exit
PB: predicated region body
PF: predicated region fallthrough
CT: control target
= control target key end

     0   :  { %8 = vsyncpa [#allocation4], 0  ;;  %s3689_s0 = inlined_call_operand.hbm [shape: bf16[4096,128], index: 0, kind: input, shape index: {}]   ;;  %s3690_s1 = inlined_call_operand.hbm [shape: bf16[128,128], index: 1, kind: input, shape index: {}]   ;;  %s3691_s2 = inlined_call_operand.hbm [shape: f32[1,128], index: 2, kind: input, shape index: {}]   ;;  %s3692_s3 = inlined_call_operand.hbm [shape: f32[4096,128], index: 3, kind: output, shape index: {}]  }
   0x1   :  { %10 = vsyncpa [#allocation4 + $0x1], 0 }
   0x2   :  { %11 = vsyncpa [#allocation7], 0 }
   0x3   :  { %12 = vsyncpa [#allocation5], 0 }
   0x4   :  { %14 = vsyncpa [#allocation5 + $0x1], 0  ;;  %s3108_s12 = smov 0   ;;  %s3110_s13 = smov 0  }
   0x5   :  { %s3112_s14 = smov 0   ;;  %s3114_s15 = smov 0  }
   0x6   :  { %s3116_s16 = smov 0   ;;  %s3118_s17 = smov 0  }
   0x7 LB: > { %s2421_s18 = sadd.s32 4294967295, %s3078_s17   ;;  %s2422_s19 = sadd.s32 4294967294, %s3078_s17   ;;  %s3078_s17 = sphi %s3118_s17, %s20_s17   ;;  %s3074_s16 = sphi %s3116_s16, %s3714_s16   ;;  %s3070_s15 = sphi %s3114_s15, %s3713_s15   ;;  %s3066_s14 = sphi %s3112_s14, %s3712_s14   ;;  %s3062_s13 = sphi %s3110_s13, %s3711_s13   ;;  %s3058_s12 = sphi %s3108_s12, %s3710_s12  }
   0x8   : > { %p61_p0 = scmp.ne.s32.totalorder %s3062_s13, %s3058_s12  ;;  %p3142_p1 = scmp.eq.s32.totalorder %s2421_s18, 0 }
   0x9   : > { %p3146_p2 = scmp.eq.s32.totalorder %s2421_s18, 3  ;;  %p147_p3 = scmp.eq.s32.totalorder %s2422_s19, 3 }
   0xa   : > { %s3697_s20 = scalar_select %p3142_p1, 1, 0 }
   0xb   : > { %s3698_s21 = scalar_select %p3146_p2, 1, 0 }
   0xc   : > { %p3152_p4 = por %p3142_p1, %p61_p0  ;;  %p2423_p5 = scmp.ge.s32.totalorder %s3078_s17, 1 }
   0xd   : > { %p3157_p6 = por %p147_p3, %p61_p0  ;;  %p154_p7 = scmp.lt.s32.totalorder %s3078_s17, 5 }
   0xe   : > { %s3699_s22 = scalar_select %p3152_p4, 1, 0 }
   0xf   : > { %s3700_s23 = scalar_select %p3157_p6, 1, 0 }
  0x10   : > { %p3162_p8 = pnand %p2423_p5, %p154_p7  ;;  %s3080_s25 = smov [#allocation6]  }
  0x11   : > { %s170_s26 = sshll.u32 %s3080_s25, 4  ;;  %s3081_s28 = smov [#allocation8]   ;;  %s171_s26 = int_to_ptr.vmem [resolvable:$true] %s170_s26 }
  0x12   : > { %s3701_s24 = scalar_select %p3162_p8, 1, 0 }
  0x13   : > { %p2759_p9 = pneg %p3162_p8  ;;  %s186_s29 = sshll.u32 %s3081_s28, 4  ;;  %s3174_s29 = int_to_ptr.vmem [resolvable:$true] %s186_s29 }
  0x14   : > { %s2906_s5 = scalar_lea.hbm %s3690_s1, 1024 }
  0x15   : > { %p3170_p10 = pnand %p2759_p9, %p3142_p1  ;;  %p2907_p11 = scmp.ne.s32.totalorder %s3690_s1, %s2906_s5 }
  0x16   : > { %p2913_p3 = scmp.lt.u32.totalorder %s2906_s5, %s3690_s1 }
  0x17   : > { %p2908_p12 = pneg %p3170_p10 }
  0x19   : > { %p2909_p13 = pnand %p2908_p12, %p2907_p11 }
  0x1b   : > { %p2910_p0 = pneg %p2909_p13 }
  0x1d   : > { %p2915_p5 = pnand %p2913_p3, %p2910_p0 }
  0x1f   : > { %2918 = shalt.err (!%p2915_p5)
}
  0x20   : > { %s2919_s10 = scalar_lea.vmem %s171_s26, 1024  ;;  %p2927_p1 = scmp.lt.s32.totalorder %s171_s26, %s171_s26 }
  0x21   : > { %p2920_p7 = scmp.ne.s32.totalorder %s171_s26, %s2919_s10  ;;  %p2928_p4 = scmp.lt.s32.totalorder %s2919_s10, %s2919_s10 }
  0x23   : > { %p2922_p9 = pnand %p2920_p7, %p2908_p12  ;;  %p2929_p8 = por %p2928_p4, %p2927_p1 }
  0x25   : > { %p2923_p6 = pneg %p2922_p9 }
  0x27   : > { %p2930_p2 = pnand %p2929_p8, %p2923_p6 }
  0x29   : > { %2933 = shalt.err (!%p2930_p2)
}
  0x2a   : > { %s3082_s11 = smov 64   ;;  %s3083_s18 = smov 4  }
  0x2b   : > { %2762 = dma.hbm_to_vmem [thread:$0]  (!%p3170_p10), %s3690_s1, 1024, %s171_s26, [#allocation7], %s3082_s11, %s3082_s11, %s3083_s18  }
  0x2c   : > { %s2934_s4 = scalar_lea.hbm %s3691_s2, 16 }
  0x2d   : > { %p2935_p1 = scmp.ne.s32.totalorder %s3691_s2, %s2934_s4  ;;  %p2941_p6 = scmp.lt.u32.totalorder %s2934_s4, %s3691_s2 }
  0x2f   : > { %p2937_p2 = pnand %p2935_p1, %p2908_p12 }
  0x31   : > { %p2938_p4 = pneg %p2937_p2 }
  0x33   : > { %p2943_p8 = pnand %p2941_p6, %p2938_p4 }
  0x35   : > { %2946 = shalt.err (!%p2943_p8)
}
  0x36   : > { %s2947_s26 = scalar_lea.vmem %s3174_s29, 16  ;;  %s2954_s9 = scalar_lea.vmem %s3174_s29, 32 }
  0x37   : > { %p2948_p11 = scmp.ne.s32.totalorder %s3174_s29, %s2947_s26  ;;  %p2955_p3 = scmp.lt.s32.totalorder %s3174_s29, %s3174_s29 }
  0x38   : > { %p2956_p5 = scmp.lt.s32.totalorder %s2954_s9, %s2947_s26 }
  0x39   : > { %p2950_p13 = pnand %p2948_p11, %p2908_p12 }
  0x3a   : > { %p2957_p7 = por %p2956_p5, %p2955_p3 }
  0x3b   : > { %p2951_p0 = pneg %p2950_p13 }
  0x3d   : > { %p2958_p9 = pnand %p2957_p7, %p2951_p0 }
  0x3f   : > { %2961 = shalt.err (!%p2958_p9)
}
  0x40   : > { %2765 = dma.hbm_to_vmem [thread:$0]  (!%p3170_p10), %s3691_s2, 16, %s3174_s29, [#allocation7]  }
  0x41   : > { %s39_s25 = sadd.s32 1, %s3074_s16  ;;  %s48_s28 = sadd.s32 1, %s3066_s14 }
  0x42   : > { %p41_p12 = scmp.ge.s32.totalorder %s39_s25, 4  ;;  %p55_p1 = scmp.ne.s32.totalorder %s3066_s14, %s3062_s13 }
  0x43   : > { %p56_p2 = scmp.eq.s32.totalorder %s3078_s17, 0  ;;  %p2776_p4 = scmp.lt.s32.totalorder %s3078_s17, 4 }
  0x44   : > { %s3716_s25 = smov (%p41_p12, %s39_s25), 0  ;;  %p3703_p8 = scmp.ne.s32.totalorder %s3698_s21, 0 }
  0x45   : > { %p57_p6 = por %p56_p2, %p55_p1  ;;  %s43_s30 = ssub.s32 %s3074_s16, %s3716_s25 }
  0x46   : > { %p3237_p11 = por %p3703_p8, %p55_p1  ;;  %s197_s4 = sand.u32 1, %s3066_s14  }
  0x47   : > { %p46_p13 = scmp.eq.s32.totalorder %s43_s30, 0  ;;  %s2427_s29 = sshll.u32 %s197_s4, 9 }
  0x48   : > { %s2513_s5 = sshll.u32 %s3074_s16, 13  ;;  %s201_s21 = scalar_lea.vmem [#allocation3], %s2427_s29 }
  0x49   : > { %s3246_s6 = scalar_select %p46_p13, %s3066_s14, %s48_s28  }
  0x4a   : > { %s3251_s26 = scalar_lea.hbm %s3689_s0, %s2513_s5  ;;  %s209_s9 = sshll.u32 %s201_s21, 4  ;;  %s3259_s9 = int_to_ptr.vmem [resolvable:$true] %s209_s9 }
  0x4b   : > { %p3255_p10 = pnand %p2776_p4, %p57_p6  ;;  %s3261_s19 = scalar_lea.sflag [#allocation4], %s197_s4 }
  0x4c   : > { %s2962_s28 = scalar_lea.hbm %s3251_s26, 8192  ;;  %s2967_s5 = scalar_lea.hbm %s3689_s0, 32768 }
  0x4d   : > { %p2963_p0 = scmp.ne.s32.totalorder %s3251_s26, %s2962_s28  ;;  %p2964_p3 = pneg %p3255_p10 }
  0x4e   : > { %p2968_p9 = scmp.lt.u32.totalorder %s3251_s26, %s3689_s0  ;;  %p2969_p12 = scmp.lt.u32.totalorder %s2967_s5, %s2962_s28 }
  0x4f   : > { %p2965_p5 = pnand %p2964_p3, %p2963_p0  ;;  %p2971_p2 = scmp.lt.u32.totalorder %s2962_s28, %s3251_s26 }
  0x50   : > { %p2970_p1 = por %p2969_p12, %p2968_p9 }
  0x51   : > { %p2966_p7 = pneg %p2965_p5 }
  0x52   : > { %p2972_p4 = por %p2971_p2, %p2970_p1 }
  0x54   : > { %p2973_p6 = pnand %p2972_p4, %p2966_p7 }
  0x56   : > { %2976 = shalt.err (!%p2973_p6)
}
  0x57   : > { %s2977_s4 = scalar_lea.vmem %s3259_s9, 8192  ;;  %s3084_s21 = smov [#allocation3]  }
  0x58   : > { %p2978_p8 = scmp.ne.s32.totalorder %s3259_s9, %s2977_s4  ;;  %s2982_s30 = sshll.u32 %s3084_s21, 4  ;;  %s2983_s30 = int_to_ptr.vmem [resolvable:$false] %s2982_s30 }
  0x59   : > { %s2984_s29 = scalar_lea.vmem %s2983_s30, 16384  ;;  %p2985_p5 = scmp.lt.s32.totalorder %s3259_s9, %s2983_s30 }
  0x5a   : > { %p2980_p13 = pnand %p2978_p8, %p2964_p3  ;;  %p2986_p9 = scmp.lt.s32.totalorder %s2984_s29, %s2977_s4 }
  0x5c   : > { %p2981_p0 = pneg %p2980_p13  ;;  %p2987_p12 = por %p2986_p9, %p2985_p5 }
  0x5e   : > { %p2988_p1 = pnand %p2987_p12, %p2981_p0 }
  0x60   : > { %2991 = shalt.err (!%p2988_p1)
}
  0x61   : > { %2769 = dma.hbm_to_vmem [thread:$0]  (!%p3255_p10), %s3251_s26, 8192, %s3259_s9, %s3261_s19, %s3082_s11, %s3082_s11, %s3083_s18  }
  0x62   : > { %p3706_p3 = scmp.ne.s32.totalorder %s3701_s24, 0 }
  0x63   : > { %s3295_s28 = sand.u32 (!%p3706_p3), 1, %s3062_s13   ;;  %p3707_p7 = scmp.ne.s32.totalorder (!%p3706_p3), %s3699_s22, 0 }
  0x64   : > { %221 = sbr.rel (%p3706_p3) target bundleno = 496 (0x1f0), region = 32  ;;  %s2431_s5 = sshll.u32 (!%p3706_p3), %s3295_s28, 9 }
  0x65   : > { %s224_s7 = scalar_lea.sflag (!%p3706_p3), [#allocation4], %s3295_s28  ;;  %s3299_s8 = scalar_lea.vmem (!%p3706_p3), [#allocation3], %s2431_s5 }
  0x6b   : > { %3045 = dma.done.wait (%p3707_p7), %s224_s7, 8192  }
  0x6c   : > { %3047 = vsyncadd (%p3707_p7), %s224_s7, 4294959104  ;;  %p3708_p10 = scmp.ne.s32.totalorder %s3697_s20, 0 }
  0x6e   : > { %3049 = dma.done.wait (%p3708_p10), [#allocation7], 1040  }
  0x6f   : > { %3051 = vsyncadd (%p3708_p10), [#allocation7], 4294966256  ;;  %v2834_v0 = vld [vmem:[#allocation6] sm:$0xff]   ;;  %v2835_v1 = vld [vmem:[#allocation6 + $0x8] sm:$0xff]   ;;  %s2434_s20 = sshll.u32 %s3295_s28, 10  ;;  %s2514_s24 = sshll.u32 %s3070_s15, 14 }
  0x70   : > { %2587 = vmatprep.subr.bf16.mxu0 %v2834_v0  ;;  %2731 = vmatprep.subr.bf16.mxu1 %v2834_v0  ;;  %v2836_v2 = vld [vmem:[#allocation6 + $0x10] sm:$0xff]   ;;  %v2837_v3 = vld [vmem:[#allocation6 + $0x18] sm:$0xff]   ;;  %v2842_v4 = vld [vmem:[%s3299_s8] sm:$0xff]   ;;  %s3380_s22 = scalar_lea.vmem [#allocation9], %s2434_s20  ;;  %s3631_s26 = scalar_lea.hbm %s3692_s3, %s2514_s24 }
  0x71   : > { %2588 = vmatpush3.bf16.msra.mxu0 %v2834_v0  ;;  %2739 = vmatpush3.bf16.msra.mxu1 %v2834_v0  ;;  %v2843_v5 = vld [vmem:[%s3299_s8 + $0x100] sm:$0xff]   ;;  %v2839_v7 = vld [vmem:[#allocation6 + $0x28] sm:$0xff]   ;;  %v2840_v8 = vld [vmem:[#allocation6 + $0x30] sm:$0xff]   ;;  %s2308_s11 = sshll.u32 %s3380_s22, 4  ;;  %s2294_s9 = scalar_lea.sflag [#allocation5], %s3295_s28  ;;  %s3633_s11 = int_to_ptr.vmem [resolvable:$true] %s2308_s11 }
  0x72   : > { %2589 = vmatprep.subr.bf16.mxu0 %v2835_v1  ;;  %2732 = vmatprep.subr.bf16.mxu1 %v2835_v1  ;;  %v2838_v6 = vld [vmem:[#allocation6 + $0x20] sm:$0xff]   ;;  %v2841_v9 = vld [vmem:[#allocation6 + $0x38] sm:$0xff]   ;;  %v2844_v10 = vld [vmem:[%s3299_s8 + $0x8] sm:$0xff]   ;;  %s2992_s10 = scalar_lea.vmem %s3633_s11, 16384  ;;  %s3085_s19 = smov [#allocation9]  }
  0x73   : > { %2603 = vmatprep.mubr.bf16.mxu0 %v2842_v4  ;;  %2667 = vmatprep.mubr.bf16.mxu1 %v2843_v5  ;;  %v2845_v11 = vld [vmem:[%s3299_s8 + $0x108] sm:$0xff]   ;;  %v2846_v12 = vld [vmem:[%s3299_s8 + $0x10] sm:$0xff]   ;;  %v2848_v14 = vld [vmem:[%s3299_s8 + $0x18] sm:$0xff]   ;;  %p2993_p2 = scmp.ne.s32.totalorder %s3633_s11, %s2992_s10  ;;  %s2996_s4 = sshll.u32 %s3085_s19, 4  ;;  %s2997_s4 = int_to_ptr.vmem [resolvable:$false] %s2996_s4 }
  0x74   : > { %v2847_v13 = vld [vmem:[%s3299_s8 + $0x110] sm:$0xff]   ;;  %v2849_v15 = vld [vmem:[%s3299_s8 + $0x118] sm:$0xff]   ;;  %v2850_v16 = vld [vmem:[%s3299_s8 + $0x20] sm:$0xff]   ;;  %s2998_s21 = scalar_lea.vmem %s2997_s4, 32768  ;;  %p2999_p8 = scmp.lt.s32.totalorder %s3633_s11, %s2997_s4 }
  0x75   : > { %2590 = vmatpush3.bf16.msra.mxu0 %v2835_v1  ;;  %2740 = vmatpush3.bf16.msra.mxu1 %v2835_v1  ;;  %v2851_v17 = vld [vmem:[%s3299_s8 + $0x120] sm:$0xff]   ;;  %v2852_v18 = vld [vmem:[%s3299_s8 + $0x28] sm:$0xff]   ;;  %v2854_v20 = vld [vmem:[%s3299_s8 + $0x30] sm:$0xff]   ;;  %p2994_p4 = pnand %p2993_p2, %p3237_p11  ;;  %p3000_p13 = scmp.lt.s32.totalorder %s2998_s21, %s2992_s10 }
  0x76   : > { %2591 = vmatprep.subr.bf16.mxu0 %v2836_v2  ;;  %2733 = vmatprep.subr.bf16.mxu1 %v2836_v2  ;;  %v2853_v19 = vld [vmem:[%s3299_s8 + $0x128] sm:$0xff]   ;;  %v2855_v21 = vld [vmem:[%s3299_s8 + $0x130] sm:$0xff]   ;;  %v2856_v22 = vld [vmem:[%s3299_s8 + $0x38] sm:$0xff]  }
  0x77   : > { %v2857_v23 = vld [vmem:[%s3299_s8 + $0x138] sm:$0xff]   ;;  %v2858_v24 = vld [vmem:[%s3299_s8 + $0x40] sm:$0xff]   ;;  %v2860_v26 = vld [vmem:[%s3299_s8 + $0x48] sm:$0xff]   ;;  %p2995_p6 = pneg %p2994_p4  ;;  %p3001_p0 = por %p3000_p13, %p2999_p8 }
  0x78   : > { %v2859_v25 = vld [vmem:[%s3299_s8 + $0x140] sm:$0xff]   ;;  %v2861_v27 = vld [vmem:[%s3299_s8 + $0x148] sm:$0xff]   ;;  %v2862_v28 = vld [vmem:[%s3299_s8 + $0x50] sm:$0xff]  }
  0x79   : > { %2592 = vmatpush3.bf16.msra.mxu0 %v2836_v2  ;;  %2741 = vmatpush3.bf16.msra.mxu1 %v2836_v2  ;;  %v2863_v29 = vld [vmem:[%s3299_s8 + $0x150] sm:$0xff]   ;;  %v2864_v30 = vld [vmem:[%s3299_s8 + $0x58] sm:$0xff]   ;;  %v2866_v32 = vld [vmem:[%s3299_s8 + $0x60] sm:$0xff]   ;;  %p3002_p5 = pnand %p3001_p0, %p2995_p6 }
  0x7a   : > { %2593 = vmatprep.subr.bf16.mxu0 %v2837_v3  ;;  %2734 = vmatprep.subr.bf16.mxu1 %v2837_v3  ;;  %v2865_v31 = vld [vmem:[%s3299_s8 + $0x158] sm:$0xff]   ;;  %v2867_v33 = vld [vmem:[%s3299_s8 + $0x160] sm:$0xff]   ;;  %v2868_v34 = vld [vmem:[%s3299_s8 + $0x68] sm:$0xff]  }
  0x7b   : > { %v2869_v35 = vld [vmem:[%s3299_s8 + $0x168] sm:$0xff]   ;;  %v2870_v36 = vld [vmem:[%s3299_s8 + $0x70] sm:$0xff]   ;;  %v2872_v38 = vld [vmem:[%s3299_s8 + $0x78] sm:$0xff]  }
  0x7c   : > { %v2871_v37 = vld [vmem:[%s3299_s8 + $0x170] sm:$0xff]   ;;  %v2873_v39 = vld [vmem:[%s3299_s8 + $0x178] sm:$0xff]   ;;  %v2874_v40 = vld [vmem:[%s3299_s8 + $0x80] sm:$0xff]  }
  0x7d   : > { %2594 = vmatpush3.bf16.msra.mxu0 %v2837_v3  ;;  %2742 = vmatpush3.bf16.msra.mxu1 %v2837_v3  ;;  %v2875_v41 = vld [vmem:[%s3299_s8 + $0x180] sm:$0xff]   ;;  %v2876_v42 = vld [vmem:[%s3299_s8 + $0x88] sm:$0xff]   ;;  %v2878_v44 = vld [vmem:[%s3299_s8 + $0x90] sm:$0xff]  }
  0x7e   : > { %2595 = vmatprep.subr.bf16.mxu0 %v2838_v6  ;;  %2735 = vmatprep.subr.bf16.mxu1 %v2838_v6  ;;  %v2877_v43 = vld [vmem:[%s3299_s8 + $0x188] sm:$0xff]   ;;  %v2879_v45 = vld [vmem:[%s3299_s8 + $0x190] sm:$0xff]   ;;  %v2880_v46 = vld [vmem:[%s3299_s8 + $0x98] sm:$0xff]  }
  0x7f   : > { %v2881_v47 = vld [vmem:[%s3299_s8 + $0x198] sm:$0xff]   ;;  %v2882_v48 = vld [vmem:[%s3299_s8 + $0xa0] sm:$0xff]   ;;  %v2884_v50 = vld [vmem:[%s3299_s8 + $0xa8] sm:$0xff]  }
  0x80   : > { %v2883_v49 = vld [vmem:[%s3299_s8 + $0x1a0] sm:$0xff]   ;;  %v2885_v51 = vld [vmem:[%s3299_s8 + $0x1a8] sm:$0xff]   ;;  %v2886_v52 = vld [vmem:[%s3299_s8 + $0xb0] sm:$0xff]  }
  0x81   : > { %2596 = vmatpush3.bf16.msra.mxu0 %v2838_v6  ;;  %2743 = vmatpush3.bf16.msra.mxu1 %v2838_v6  ;;  %v2887_v53 = vld [vmem:[%s3299_s8 + $0x1b0] sm:$0xff]   ;;  %v2888_v54 = vld [vmem:[%s3299_s8 + $0xb8] sm:$0xff]   ;;  %v2890_v56 = vld [vmem:[%s3299_s8 + $0xc0] sm:$0xff]  }
  0x82   : > { %2597 = vmatprep.subr.bf16.mxu0 %v2839_v7  ;;  %2736 = vmatprep.subr.bf16.mxu1 %v2839_v7  ;;  %v2889_v55 = vld [vmem:[%s3299_s8 + $0x1b8] sm:$0xff]   ;;  %v2891_v57 = vld [vmem:[%s3299_s8 + $0x1c0] sm:$0xff]   ;;  %v2892_v58 = vld [vmem:[%s3299_s8 + $0xc8] sm:$0xff]  }
  0x83   : > { %v2893_v59 = vld [vmem:[%s3299_s8 + $0x1c8] sm:$0xff]   ;;  %v2894_v60 = vld [vmem:[%s3299_s8 + $0xd0] sm:$0xff]   ;;  %v2896_v62 = vld [vmem:[%s3299_s8 + $0xd8] sm:$0xff]  }
  0x84   : > { %v2895_v61 = vld [vmem:[%s3299_s8 + $0x1d0] sm:$0xff]   ;;  %v2897_v63 = vld [vmem:[%s3299_s8 + $0x1d8] sm:$0xff]   ;;  %v2898_v0 = vld [vmem:[%s3299_s8 + $0xe0] sm:$0xff]  }
  0x85   : > { %2598 = vmatpush3.bf16.msra.mxu0 %v2839_v7  ;;  %2744 = vmatpush3.bf16.msra.mxu1 %v2839_v7  ;;  %v2899_v1 = vld [vmem:[%s3299_s8 + $0x1e0] sm:$0xff]   ;;  %v2900_v2 = vld [vmem:[%s3299_s8 + $0xe8] sm:$0xff]   ;;  %v2902_v4 = vld [vmem:[%s3299_s8 + $0xf0] sm:$0xff]  }
  0x86   : > { %2599 = vmatprep.subr.bf16.mxu0 %v2840_v8  ;;  %2737 = vmatprep.subr.bf16.mxu1 %v2840_v8  ;;  %v2901_v3 = vld [vmem:[%s3299_s8 + $0x1e8] sm:$0xff]   ;;  %v2903_v5 = vld [vmem:[%s3299_s8 + $0x1f0] sm:$0xff]   ;;  %v2904_v6 = vld [vmem:[%s3299_s8 + $0xf8] sm:$0xff]  }
  0x87   : > { %v2905_v7 = vld [vmem:[%s3299_s8 + $0x1f8] sm:$0xff]  }
  0x89   : > { %2600 = vmatpush3.bf16.msra.mxu0 %v2840_v8  ;;  %2745 = vmatpush3.bf16.msra.mxu1 %v2840_v8  ;;  %v3374_v8 = vld [vmem:[#allocation8] ss:$0 sm:$0xff] }
  0x8a   : > { %2601 = vmatprep.subr.bf16.mxu0 %v2841_v9  ;;  %2738 = vmatprep.subr.bf16.mxu1 %v2841_v9 }
  0x8d   : > { %2602 = vmatpush3.bf16.msra.mxu0 %v2841_v9  ;;  %2746 = vmatpush3.bf16.msra.mxu1 %v2841_v9 }
  0x90   : > { %2604 = vmatmul.mubr.bf16.vlgmr.msra.gmra.mrb[0].mxu0 %v2844_v10  ;;  %2668 = vmatmul.mubr.bf16.vlgmr.msra.gmra.mrb[0].mxu1 %v2845_v11 }
  0x91   : > { %2607 = vmatprep.mubr.bf16.mxu0 %v2846_v12  ;;  %2671 = vmatprep.mubr.bf16.mxu1 %v2847_v13 }
  0x98   : > { %2608 = vmatmul.mubr.bf16.gmra.mrb[4].mxu0 %v2848_v14  ;;  %2672 = vmatmul.mubr.bf16.gmra.mrb[4].mxu1 %v2849_v15 }
  0x99   : > { %2611 = vmatprep.mubr.bf16.mxu0 %v2850_v16  ;;  %2675 = vmatprep.mubr.bf16.mxu1 %v2851_v17 }
  0xa0   : > { %2612 = vmatmul.mubr.bf16.gmra.mrb[8].mxu0 %v2852_v18  ;;  %2676 = vmatmul.mubr.bf16.gmra.mrb[8].mxu1 %v2853_v19 }
  0xa1   : > { %2615 = vmatprep.mubr.bf16.mxu0 %v2854_v20  ;;  %2679 = vmatprep.mubr.bf16.mxu1 %v2855_v21 }
  0xa8   : > { %2616 = vmatmul.mubr.bf16.gmra.mrb[12].mxu0 %v2856_v22  ;;  %2680 = vmatmul.mubr.bf16.gmra.mrb[12].mxu1 %v2857_v23 }
  0xa9   : > { %2619 = vmatprep.mubr.bf16.mxu0 %v2858_v24  ;;  %2683 = vmatprep.mubr.bf16.mxu1 %v2859_v25 }
  0xb0   : > { %2620 = vmatmul.mubr.bf16.gmra.mrb[16].mxu0 %v2860_v26  ;;  %2684 = vmatmul.mubr.bf16.gmra.mrb[16].mxu1 %v2861_v27 }
  0xb1   : > { %2623 = vmatprep.mubr.bf16.mxu0 %v2862_v28  ;;  %2687 = vmatprep.mubr.bf16.mxu1 %v2863_v29 }
  0xb8   : > { %2624 = vmatmul.mubr.bf16.gmra.mrb[20].mxu0 %v2864_v30  ;;  %2688 = vmatmul.mubr.bf16.gmra.mrb[20].mxu1 %v2865_v31 }
  0xb9   : > { %2627 = vmatprep.mubr.bf16.mxu0 %v2866_v32  ;;  %2691 = vmatprep.mubr.bf16.mxu1 %v2867_v33 }
  0xc0   : > { %2628 = vmatmul.mubr.bf16.gmra.mrb[24].mxu0 %v2868_v34  ;;  %2692 = vmatmul.mubr.bf16.gmra.mrb[24].mxu1 %v2869_v35 }
  0xc1   : > { %2631 = vmatprep.mubr.bf16.mxu0 %v2870_v36  ;;  %2695 = vmatprep.mubr.bf16.mxu1 %v2871_v37 }
  0xc8   : > { %2632 = vmatmul.mubr.bf16.gmra.mrb[28].mxu0 %v2872_v38  ;;  %2696 = vmatmul.mubr.bf16.gmra.mrb[28].mxu1 %v2873_v39 }
  0xc9   : > { %2635 = vmatprep.mubr.bf16.mxu0 %v2874_v40  ;;  %2699 = vmatprep.mubr.bf16.mxu1 %v2875_v41 }
  0xd0   : > { %2636 = vmatmul.mubr.bf16.gmra.mrb[32].mxu0 %v2876_v42  ;;  %2700 = vmatmul.mubr.bf16.gmra.mrb[32].mxu1 %v2877_v43 }
  0xd1   : > { %2639 = vmatprep.mubr.bf16.mxu0 %v2878_v44  ;;  %2703 = vmatprep.mubr.bf16.mxu1 %v2879_v45 }
  0xd8   : > { %2640 = vmatmul.mubr.bf16.gmra.mrb[36].mxu0 %v2880_v46  ;;  %2704 = vmatmul.mubr.bf16.gmra.mrb[36].mxu1 %v2881_v47 }
  0xd9   : > { %2643 = vmatprep.mubr.bf16.mxu0 %v2882_v48  ;;  %2707 = vmatprep.mubr.bf16.mxu1 %v2883_v49 }
  0xe0   : > { %2644 = vmatmul.mubr.bf16.gmra.mrb[40].mxu0 %v2884_v50  ;;  %2708 = vmatmul.mubr.bf16.gmra.mrb[40].mxu1 %v2885_v51 }
  0xe1   : > { %2647 = vmatprep.mubr.bf16.mxu0 %v2886_v52  ;;  %2711 = vmatprep.mubr.bf16.mxu1 %v2887_v53 }
  0xe8   : > { %2648 = vmatmul.mubr.bf16.gmra.mrb[44].mxu0 %v2888_v54  ;;  %2712 = vmatmul.mubr.bf16.gmra.mrb[44].mxu1 %v2889_v55 }
  0xe9   : > { %2651 = vmatprep.mubr.bf16.mxu0 %v2890_v56  ;;  %2715 = vmatprep.mubr.bf16.mxu1 %v2891_v57 }
  0xf0   : > { %2652 = vmatmul.mubr.bf16.gmra.mrb[48].mxu0 %v2892_v58  ;;  %2716 = vmatmul.mubr.bf16.gmra.mrb[48].mxu1 %v2893_v59 }
  0xf1   : > { %2655 = vmatprep.mubr.bf16.mxu0 %v2894_v60  ;;  %2719 = vmatprep.mubr.bf16.mxu1 %v2895_v61 }
  0xf8   : > { %2656 = vmatmul.mubr.bf16.gmra.mrb[52].mxu0 %v2896_v62  ;;  %2720 = vmatmul.mubr.bf16.gmra.mrb[52].mxu1 %v2897_v63 }
  0xf9   : > { %2659 = vmatprep.mubr.bf16.mxu0 %v2898_v0  ;;  %2723 = vmatprep.mubr.bf16.mxu1 %v2899_v1 }
 0x100   : > { %2660 = vmatmul.mubr.bf16.gmra.mrb[56].mxu0 %v2900_v2  ;;  %2724 = vmatmul.mubr.bf16.gmra.mrb[56].mxu1 %v2901_v3 }
 0x101   : > { %2663 = vmatprep.mubr.bf16.mxu0 %v2902_v4  ;;  %2727 = vmatprep.mubr.bf16.mxu1 %v2903_v5 }
 0x108   : > { %2664 = vmatmul.mubr.bf16.gmra.mrb[60].mxu0 %v2904_v6  ;;  %2728 = vmatmul.mubr.bf16.gmra.mrb[60].mxu1 %v2905_v7 }
 0x163   : > { %v2605_v9 = vpop.f32.mrb[0].mxu0  ;;  %v2669_v10 = vpop.f32.mrb[0].mxu1 }
 0x164   : > { %v2039_v11 = vadd.f32 %v2605_v9, %v3374_v8  ;;  %v2103_v12 = vadd.f32 %v2669_v10, %v3374_v8  ;;  %v1132_v13 = vpop.f32.mrb[1].mxu0  ;;  %v1388_v14 = vpop.f32.mrb[1].mxu1 }
 0x165   : > { %v2037_v15 = vadd.f32 %v3374_v8, %v1132_v13  ;;  %v2101_v16 = vadd.f32 %v3374_v8, %v1388_v14  ;;  %v2606_v17 = vpop.f32.mrb[2].mxu0  ;;  %v2670_v18 = vpop.f32.mrb[2].mxu1 }
 0x166   : > { %2167 = vst [vmem:[%s3380_s22 + $0x10] sm:$0xff] %v2039_v11  ;;  %2231 = vst [vmem:[%s3380_s22 + $0x210] sm:$0xff] %v2103_v12  ;;  %v2040_v19 = vadd.f32 %v2606_v17, %v3374_v8  ;;  %v2104_v20 = vadd.f32 %v2670_v18, %v3374_v8  ;;  %v1135_v21 = vpop.f32.mrb[3].mxu0  ;;  %v1391_v22 = vpop.f32.mrb[3].mxu1 }
 0x167   : > { %2165 = vst [vmem:[%s3380_s22] sm:$0xff] %v2037_v15  ;;  %2229 = vst [vmem:[%s3380_s22 + $0x200] sm:$0xff] %v2101_v16  ;;  %v2038_v23 = vadd.f32 %v3374_v8, %v1135_v21  ;;  %v2102_v24 = vadd.f32 %v3374_v8, %v1391_v22 }
 0x168   : > { %2168 = vst [vmem:[%s3380_s22 + $0x18] sm:$0xff] %v2040_v19  ;;  %2232 = vst [vmem:[%s3380_s22 + $0x218] sm:$0xff] %v2104_v20 }
 0x169   : > { %2166 = vst [vmem:[%s3380_s22 + $0x8] sm:$0xff] %v2038_v23  ;;  %2230 = vst [vmem:[%s3380_s22 + $0x208] sm:$0xff] %v2102_v24 }
 0x16b   : > { %v2609_v25 = vpop.f32.mrb[4].mxu0  ;;  %v2673_v26 = vpop.f32.mrb[4].mxu1 }
 0x16c   : > { %v2043_v27 = vadd.f32 %v2609_v25, %v3374_v8  ;;  %v2107_v28 = vadd.f32 %v2673_v26, %v3374_v8  ;;  %v1148_v29 = vpop.f32.mrb[5].mxu0  ;;  %v1404_v30 = vpop.f32.mrb[5].mxu1 }
 0x16d   : > { %v2041_v31 = vadd.f32 %v3374_v8, %v1148_v29  ;;  %v2105_v32 = vadd.f32 %v3374_v8, %v1404_v30  ;;  %v2610_v33 = vpop.f32.mrb[6].mxu0  ;;  %v2674_v34 = vpop.f32.mrb[6].mxu1 }
 0x16e   : > { %2171 = vst [vmem:[%s3380_s22 + $0x30] sm:$0xff] %v2043_v27  ;;  %2235 = vst [vmem:[%s3380_s22 + $0x230] sm:$0xff] %v2107_v28  ;;  %v2044_v35 = vadd.f32 %v2610_v33, %v3374_v8  ;;  %v2108_v36 = vadd.f32 %v2674_v34, %v3374_v8  ;;  %v1151_v37 = vpop.f32.mrb[7].mxu0  ;;  %v1407_v38 = vpop.f32.mrb[7].mxu1 }
 0x16f   : > { %2169 = vst [vmem:[%s3380_s22 + $0x20] sm:$0xff] %v2041_v31  ;;  %2233 = vst [vmem:[%s3380_s22 + $0x220] sm:$0xff] %v2105_v32  ;;  %v2042_v39 = vadd.f32 %v3374_v8, %v1151_v37  ;;  %v2106_v40 = vadd.f32 %v3374_v8, %v1407_v38 }
 0x170   : > { %2172 = vst [vmem:[%s3380_s22 + $0x38] sm:$0xff] %v2044_v35  ;;  %2236 = vst [vmem:[%s3380_s22 + $0x238] sm:$0xff] %v2108_v36 }
 0x171   : > { %2170 = vst [vmem:[%s3380_s22 + $0x28] sm:$0xff] %v2042_v39  ;;  %2234 = vst [vmem:[%s3380_s22 + $0x228] sm:$0xff] %v2106_v40 }
 0x173   : > { %v2613_v41 = vpop.f32.mrb[8].mxu0  ;;  %v2677_v42 = vpop.f32.mrb[8].mxu1 }
 0x174   : > { %v2047_v43 = vadd.f32 %v2613_v41, %v3374_v8  ;;  %v2111_v44 = vadd.f32 %v2677_v42, %v3374_v8  ;;  %v1164_v45 = vpop.f32.mrb[9].mxu0  ;;  %v1420_v46 = vpop.f32.mrb[9].mxu1 }
 0x175   : > { %v2045_v47 = vadd.f32 %v3374_v8, %v1164_v45  ;;  %v2109_v48 = vadd.f32 %v3374_v8, %v1420_v46  ;;  %v2614_v49 = vpop.f32.mrb[10].mxu0  ;;  %v2678_v50 = vpop.f32.mrb[10].mxu1 }
 0x176   : > { %2175 = vst [vmem:[%s3380_s22 + $0x50] sm:$0xff] %v2047_v43  ;;  %2239 = vst [vmem:[%s3380_s22 + $0x250] sm:$0xff] %v2111_v44  ;;  %v2048_v51 = vadd.f32 %v2614_v49, %v3374_v8  ;;  %v2112_v52 = vadd.f32 %v2678_v50, %v3374_v8  ;;  %v1167_v53 = vpop.f32.mrb[11].mxu0  ;;  %v1423_v54 = vpop.f32.mrb[11].mxu1 }
 0x177   : > { %2173 = vst [vmem:[%s3380_s22 + $0x40] sm:$0xff] %v2045_v47  ;;  %2237 = vst [vmem:[%s3380_s22 + $0x240] sm:$0xff] %v2109_v48  ;;  %v2046_v55 = vadd.f32 %v3374_v8, %v1167_v53  ;;  %v2110_v56 = vadd.f32 %v3374_v8, %v1423_v54 }
 0x178   : > { %2176 = vst [vmem:[%s3380_s22 + $0x58] sm:$0xff] %v2048_v51  ;;  %2240 = vst [vmem:[%s3380_s22 + $0x258] sm:$0xff] %v2112_v52 }
 0x179   : > { %2174 = vst [vmem:[%s3380_s22 + $0x48] sm:$0xff] %v2046_v55  ;;  %2238 = vst [vmem:[%s3380_s22 + $0x248] sm:$0xff] %v2110_v56 }
 0x17b   : > { %v2617_v57 = vpop.f32.mrb[12].mxu0  ;;  %v2681_v58 = vpop.f32.mrb[12].mxu1 }
 0x17c   : > { %v2051_v59 = vadd.f32 %v2617_v57, %v3374_v8  ;;  %v2115_v60 = vadd.f32 %v2681_v58, %v3374_v8  ;;  %v1180_v61 = vpop.f32.mrb[13].mxu0  ;;  %v1436_v62 = vpop.f32.mrb[13].mxu1 }
 0x17d   : > { %v2049_v63 = vadd.f32 %v3374_v8, %v1180_v61  ;;  %v2113_v0 = vadd.f32 %v3374_v8, %v1436_v62  ;;  %v2618_v1 = vpop.f32.mrb[14].mxu0  ;;  %v2682_v2 = vpop.f32.mrb[14].mxu1 }
 0x17e   : > { %2179 = vst [vmem:[%s3380_s22 + $0x70] sm:$0xff] %v2051_v59  ;;  %2243 = vst [vmem:[%s3380_s22 + $0x270] sm:$0xff] %v2115_v60  ;;  %v2052_v3 = vadd.f32 %v2618_v1, %v3374_v8  ;;  %v2116_v4 = vadd.f32 %v2682_v2, %v3374_v8  ;;  %v1183_v5 = vpop.f32.mrb[15].mxu0  ;;  %v1439_v6 = vpop.f32.mrb[15].mxu1 }
 0x17f   : > { %2177 = vst [vmem:[%s3380_s22 + $0x60] sm:$0xff] %v2049_v63  ;;  %2241 = vst [vmem:[%s3380_s22 + $0x260] sm:$0xff] %v2113_v0  ;;  %v2050_v7 = vadd.f32 %v3374_v8, %v1183_v5  ;;  %v2114_v9 = vadd.f32 %v3374_v8, %v1439_v6 }
 0x180   : > { %2180 = vst [vmem:[%s3380_s22 + $0x78] sm:$0xff] %v2052_v3  ;;  %2244 = vst [vmem:[%s3380_s22 + $0x278] sm:$0xff] %v2116_v4 }
 0x181   : > { %2178 = vst [vmem:[%s3380_s22 + $0x68] sm:$0xff] %v2050_v7  ;;  %2242 = vst [vmem:[%s3380_s22 + $0x268] sm:$0xff] %v2114_v9 }
 0x183   : > { %v2621_v10 = vpop.f32.mrb[16].mxu0  ;;  %v2685_v11 = vpop.f32.mrb[16].mxu1 }
 0x184   : > { %v2055_v12 = vadd.f32 %v2621_v10, %v3374_v8  ;;  %v2119_v13 = vadd.f32 %v2685_v11, %v3374_v8  ;;  %v1196_v14 = vpop.f32.mrb[17].mxu0  ;;  %v1452_v15 = vpop.f32.mrb[17].mxu1 }
 0x185   : > { %v2053_v16 = vadd.f32 %v3374_v8, %v1196_v14  ;;  %v2117_v17 = vadd.f32 %v3374_v8, %v1452_v15  ;;  %v2622_v18 = vpop.f32.mrb[18].mxu0  ;;  %v2686_v19 = vpop.f32.mrb[18].mxu1 }
 0x186   : > { %2183 = vst [vmem:[%s3380_s22 + $0x90] sm:$0xff] %v2055_v12  ;;  %2247 = vst [vmem:[%s3380_s22 + $0x290] sm:$0xff] %v2119_v13  ;;  %v2056_v20 = vadd.f32 %v2622_v18, %v3374_v8  ;;  %v2120_v21 = vadd.f32 %v2686_v19, %v3374_v8  ;;  %v1199_v22 = vpop.f32.mrb[19].mxu0  ;;  %v1455_v23 = vpop.f32.mrb[19].mxu1 }
 0x187   : > { %2181 = vst [vmem:[%s3380_s22 + $0x80] sm:$0xff] %v2053_v16  ;;  %2245 = vst [vmem:[%s3380_s22 + $0x280] sm:$0xff] %v2117_v17  ;;  %v2054_v24 = vadd.f32 %v3374_v8, %v1199_v22  ;;  %v2118_v25 = vadd.f32 %v3374_v8, %v1455_v23 }
 0x188   : > { %2184 = vst [vmem:[%s3380_s22 + $0x98] sm:$0xff] %v2056_v20  ;;  %2248 = vst [vmem:[%s3380_s22 + $0x298] sm:$0xff] %v2120_v21 }
 0x189   : > { %2182 = vst [vmem:[%s3380_s22 + $0x88] sm:$0xff] %v2054_v24  ;;  %2246 = vst [vmem:[%s3380_s22 + $0x288] sm:$0xff] %v2118_v25 }
 0x18b   : > { %v2625_v26 = vpop.f32.mrb[20].mxu0  ;;  %v2689_v27 = vpop.f32.mrb[20].mxu1 }
 0x18c   : > { %v2059_v28 = vadd.f32 %v2625_v26, %v3374_v8  ;;  %v2123_v29 = vadd.f32 %v2689_v27, %v3374_v8  ;;  %v1212_v30 = vpop.f32.mrb[21].mxu0  ;;  %v1468_v31 = vpop.f32.mrb[21].mxu1 }
 0x18d   : > { %v2057_v32 = vadd.f32 %v3374_v8, %v1212_v30  ;;  %v2121_v33 = vadd.f32 %v3374_v8, %v1468_v31  ;;  %v2626_v34 = vpop.f32.mrb[22].mxu0  ;;  %v2690_v35 = vpop.f32.mrb[22].mxu1 }
 0x18e   : > { %2187 = vst [vmem:[%s3380_s22 + $0xb0] sm:$0xff] %v2059_v28  ;;  %2251 = vst [vmem:[%s3380_s22 + $0x2b0] sm:$0xff] %v2123_v29  ;;  %v2060_v36 = vadd.f32 %v2626_v34, %v3374_v8  ;;  %v2124_v37 = vadd.f32 %v2690_v35, %v3374_v8  ;;  %v1215_v38 = vpop.f32.mrb[23].mxu0  ;;  %v1471_v39 = vpop.f32.mrb[23].mxu1 }
 0x18f   : > { %2185 = vst [vmem:[%s3380_s22 + $0xa0] sm:$0xff] %v2057_v32  ;;  %2249 = vst [vmem:[%s3380_s22 + $0x2a0] sm:$0xff] %v2121_v33  ;;  %v2058_v40 = vadd.f32 %v3374_v8, %v1215_v38  ;;  %v2122_v41 = vadd.f32 %v3374_v8, %v1471_v39 }
 0x190   : > { %2188 = vst [vmem:[%s3380_s22 + $0xb8] sm:$0xff] %v2060_v36  ;;  %2252 = vst [vmem:[%s3380_s22 + $0x2b8] sm:$0xff] %v2124_v37 }
 0x191   : > { %2186 = vst [vmem:[%s3380_s22 + $0xa8] sm:$0xff] %v2058_v40  ;;  %2250 = vst [vmem:[%s3380_s22 + $0x2a8] sm:$0xff] %v2122_v41 }
 0x193   : > { %v2629_v42 = vpop.f32.mrb[24].mxu0  ;;  %v2693_v43 = vpop.f32.mrb[24].mxu1 }
 0x194   : > { %v2063_v44 = vadd.f32 %v2629_v42, %v3374_v8  ;;  %v2127_v45 = vadd.f32 %v2693_v43, %v3374_v8  ;;  %v1228_v46 = vpop.f32.mrb[25].mxu0  ;;  %v1484_v47 = vpop.f32.mrb[25].mxu1 }
 0x195   : > { %v2061_v48 = vadd.f32 %v3374_v8, %v1228_v46  ;;  %v2125_v49 = vadd.f32 %v3374_v8, %v1484_v47  ;;  %v2630_v50 = vpop.f32.mrb[26].mxu0  ;;  %v2694_v51 = vpop.f32.mrb[26].mxu1 }
 0x196   : > { %2191 = vst [vmem:[%s3380_s22 + $0xd0] sm:$0xff] %v2063_v44  ;;  %2255 = vst [vmem:[%s3380_s22 + $0x2d0] sm:$0xff] %v2127_v45  ;;  %v2064_v52 = vadd.f32 %v2630_v50, %v3374_v8  ;;  %v2128_v53 = vadd.f32 %v2694_v51, %v3374_v8  ;;  %v1231_v54 = vpop.f32.mrb[27].mxu0  ;;  %v1487_v55 = vpop.f32.mrb[27].mxu1 }
 0x197   : > { %2189 = vst [vmem:[%s3380_s22 + $0xc0] sm:$0xff] %v2061_v48  ;;  %2253 = vst [vmem:[%s3380_s22 + $0x2c0] sm:$0xff] %v2125_v49  ;;  %v2062_v56 = vadd.f32 %v3374_v8, %v1231_v54  ;;  %v2126_v57 = vadd.f32 %v3374_v8, %v1487_v55 }
 0x198   : > { %2192 = vst [vmem:[%s3380_s22 + $0xd8] sm:$0xff] %v2064_v52  ;;  %2256 = vst [vmem:[%s3380_s22 + $0x2d8] sm:$0xff] %v2128_v53 }
 0x199   : > { %2190 = vst [vmem:[%s3380_s22 + $0xc8] sm:$0xff] %v2062_v56  ;;  %2254 = vst [vmem:[%s3380_s22 + $0x2c8] sm:$0xff] %v2126_v57 }
 0x19b   : > { %v2633_v58 = vpop.f32.mrb[28].mxu0  ;;  %v2697_v59 = vpop.f32.mrb[28].mxu1 }
 0x19c   : > { %v2067_v60 = vadd.f32 %v2633_v58, %v3374_v8  ;;  %v2131_v61 = vadd.f32 %v2697_v59, %v3374_v8  ;;  %v1244_v62 = vpop.f32.mrb[29].mxu0  ;;  %v1500_v63 = vpop.f32.mrb[29].mxu1 }
 0x19d   : > { %v2065_v0 = vadd.f32 %v3374_v8, %v1244_v62  ;;  %v2129_v1 = vadd.f32 %v3374_v8, %v1500_v63  ;;  %v2634_v2 = vpop.f32.mrb[30].mxu0  ;;  %v2698_v3 = vpop.f32.mrb[30].mxu1 }
 0x19e   : > { %2195 = vst [vmem:[%s3380_s22 + $0xf0] sm:$0xff] %v2067_v60  ;;  %2259 = vst [vmem:[%s3380_s22 + $0x2f0] sm:$0xff] %v2131_v61  ;;  %v2068_v4 = vadd.f32 %v2634_v2, %v3374_v8  ;;  %v2132_v5 = vadd.f32 %v2698_v3, %v3374_v8  ;;  %v1247_v6 = vpop.f32.mrb[31].mxu0  ;;  %v1503_v7 = vpop.f32.mrb[31].mxu1 }
 0x19f   : > { %2193 = vst [vmem:[%s3380_s22 + $0xe0] sm:$0xff] %v2065_v0  ;;  %2257 = vst [vmem:[%s3380_s22 + $0x2e0] sm:$0xff] %v2129_v1  ;;  %v2066_v9 = vadd.f32 %v3374_v8, %v1247_v6  ;;  %v2130_v10 = vadd.f32 %v3374_v8, %v1503_v7 }
 0x1a0   : > { %2196 = vst [vmem:[%s3380_s22 + $0xf8] sm:$0xff] %v2068_v4  ;;  %2260 = vst [vmem:[%s3380_s22 + $0x2f8] sm:$0xff] %v2132_v5 }
 0x1a1   : > { %2194 = vst [vmem:[%s3380_s22 + $0xe8] sm:$0xff] %v2066_v9  ;;  %2258 = vst [vmem:[%s3380_s22 + $0x2e8] sm:$0xff] %v2130_v10 }
 0x1a3   : > { %v2637_v11 = vpop.f32.mrb[32].mxu0  ;;  %v2701_v12 = vpop.f32.mrb[32].mxu1 }
 0x1a4   : > { %v2071_v13 = vadd.f32 %v2637_v11, %v3374_v8  ;;  %v2135_v14 = vadd.f32 %v2701_v12, %v3374_v8  ;;  %v1260_v15 = vpop.f32.mrb[33].mxu0  ;;  %v1516_v16 = vpop.f32.mrb[33].mxu1 }
 0x1a5   : > { %v2069_v17 = vadd.f32 %v3374_v8, %v1260_v15  ;;  %v2133_v18 = vadd.f32 %v3374_v8, %v1516_v16  ;;  %v2638_v19 = vpop.f32.mrb[34].mxu0  ;;  %v2702_v20 = vpop.f32.mrb[34].mxu1 }
 0x1a6   : > { %2199 = vst [vmem:[%s3380_s22 + $0x110] sm:$0xff] %v2071_v13  ;;  %2263 = vst [vmem:[%s3380_s22 + $0x310] sm:$0xff] %v2135_v14  ;;  %v2072_v21 = vadd.f32 %v2638_v19, %v3374_v8  ;;  %v2136_v22 = vadd.f32 %v2702_v20, %v3374_v8  ;;  %v1263_v23 = vpop.f32.mrb[35].mxu0  ;;  %v1519_v24 = vpop.f32.mrb[35].mxu1 }
 0x1a7   : > { %2197 = vst [vmem:[%s3380_s22 + $0x100] sm:$0xff] %v2069_v17  ;;  %2261 = vst [vmem:[%s3380_s22 + $0x300] sm:$0xff] %v2133_v18  ;;  %v2070_v25 = vadd.f32 %v3374_v8, %v1263_v23  ;;  %v2134_v26 = vadd.f32 %v3374_v8, %v1519_v24 }
 0x1a8   : > { %2200 = vst [vmem:[%s3380_s22 + $0x118] sm:$0xff] %v2072_v21  ;;  %2264 = vst [vmem:[%s3380_s22 + $0x318] sm:$0xff] %v2136_v22 }
 0x1a9   : > { %2198 = vst [vmem:[%s3380_s22 + $0x108] sm:$0xff] %v2070_v25  ;;  %2262 = vst [vmem:[%s3380_s22 + $0x308] sm:$0xff] %v2134_v26 }
 0x1ab   : > { %v2641_v27 = vpop.f32.mrb[36].mxu0  ;;  %v2705_v28 = vpop.f32.mrb[36].mxu1 }
 0x1ac   : > { %v2075_v29 = vadd.f32 %v2641_v27, %v3374_v8  ;;  %v2139_v30 = vadd.f32 %v2705_v28, %v3374_v8  ;;  %v1276_v31 = vpop.f32.mrb[37].mxu0  ;;  %v1532_v32 = vpop.f32.mrb[37].mxu1 }
 0x1ad   : > { %v2073_v33 = vadd.f32 %v3374_v8, %v1276_v31  ;;  %v2137_v34 = vadd.f32 %v3374_v8, %v1532_v32  ;;  %v2642_v35 = vpop.f32.mrb[38].mxu0  ;;  %v2706_v36 = vpop.f32.mrb[38].mxu1 }
 0x1ae   : > { %2203 = vst [vmem:[%s3380_s22 + $0x130] sm:$0xff] %v2075_v29  ;;  %2267 = vst [vmem:[%s3380_s22 + $0x330] sm:$0xff] %v2139_v30  ;;  %v2076_v37 = vadd.f32 %v2642_v35, %v3374_v8  ;;  %v2140_v38 = vadd.f32 %v2706_v36, %v3374_v8  ;;  %v1279_v39 = vpop.f32.mrb[39].mxu0  ;;  %v1535_v40 = vpop.f32.mrb[39].mxu1 }
 0x1af   : > { %2201 = vst [vmem:[%s3380_s22 + $0x120] sm:$0xff] %v2073_v33  ;;  %2265 = vst [vmem:[%s3380_s22 + $0x320] sm:$0xff] %v2137_v34  ;;  %v2074_v41 = vadd.f32 %v3374_v8, %v1279_v39  ;;  %v2138_v42 = vadd.f32 %v3374_v8, %v1535_v40 }
 0x1b0   : > { %2204 = vst [vmem:[%s3380_s22 + $0x138] sm:$0xff] %v2076_v37  ;;  %2268 = vst [vmem:[%s3380_s22 + $0x338] sm:$0xff] %v2140_v38 }
 0x1b1   : > { %2202 = vst [vmem:[%s3380_s22 + $0x128] sm:$0xff] %v2074_v41  ;;  %2266 = vst [vmem:[%s3380_s22 + $0x328] sm:$0xff] %v2138_v42 }
 0x1b3   : > { %v2645_v43 = vpop.f32.mrb[40].mxu0  ;;  %v2709_v44 = vpop.f32.mrb[40].mxu1 }
 0x1b4   : > { %v2079_v45 = vadd.f32 %v2645_v43, %v3374_v8  ;;  %v2143_v46 = vadd.f32 %v2709_v44, %v3374_v8  ;;  %v1292_v47 = vpop.f32.mrb[41].mxu0  ;;  %v1548_v48 = vpop.f32.mrb[41].mxu1 }
 0x1b5   : > { %v2077_v49 = vadd.f32 %v3374_v8, %v1292_v47  ;;  %v2141_v50 = vadd.f32 %v3374_v8, %v1548_v48  ;;  %v2646_v51 = vpop.f32.mrb[42].mxu0  ;;  %v2710_v52 = vpop.f32.mrb[42].mxu1 }
 0x1b6   : > { %2207 = vst [vmem:[%s3380_s22 + $0x150] sm:$0xff] %v2079_v45  ;;  %2271 = vst [vmem:[%s3380_s22 + $0x350] sm:$0xff] %v2143_v46  ;;  %v2080_v53 = vadd.f32 %v2646_v51, %v3374_v8  ;;  %v2144_v54 = vadd.f32 %v2710_v52, %v3374_v8  ;;  %v1295_v55 = vpop.f32.mrb[43].mxu0  ;;  %v1551_v56 = vpop.f32.mrb[43].mxu1 }
 0x1b7   : > { %2205 = vst [vmem:[%s3380_s22 + $0x140] sm:$0xff] %v2077_v49  ;;  %2269 = vst [vmem:[%s3380_s22 + $0x340] sm:$0xff] %v2141_v50  ;;  %v2078_v57 = vadd.f32 %v3374_v8, %v1295_v55  ;;  %v2142_v58 = vadd.f32 %v3374_v8, %v1551_v56 }
 0x1b8   : > { %2208 = vst [vmem:[%s3380_s22 + $0x158] sm:$0xff] %v2080_v53  ;;  %2272 = vst [vmem:[%s3380_s22 + $0x358] sm:$0xff] %v2144_v54 }
 0x1b9   : > { %2206 = vst [vmem:[%s3380_s22 + $0x148] sm:$0xff] %v2078_v57  ;;  %2270 = vst [vmem:[%s3380_s22 + $0x348] sm:$0xff] %v2142_v58 }
 0x1bb   : > { %v2649_v59 = vpop.f32.mrb[44].mxu0  ;;  %v2713_v60 = vpop.f32.mrb[44].mxu1 }
 0x1bc   : > { %v2083_v61 = vadd.f32 %v2649_v59, %v3374_v8  ;;  %v2147_v62 = vadd.f32 %v2713_v60, %v3374_v8  ;;  %v1308_v63 = vpop.f32.mrb[45].mxu0  ;;  %v1564_v0 = vpop.f32.mrb[45].mxu1 }
 0x1bd   : > { %v2081_v1 = vadd.f32 %v3374_v8, %v1308_v63  ;;  %v2145_v2 = vadd.f32 %v3374_v8, %v1564_v0  ;;  %v2650_v3 = vpop.f32.mrb[46].mxu0  ;;  %v2714_v4 = vpop.f32.mrb[46].mxu1 }
 0x1be   : > { %2211 = vst [vmem:[%s3380_s22 + $0x170] sm:$0xff] %v2083_v61  ;;  %2275 = vst [vmem:[%s3380_s22 + $0x370] sm:$0xff] %v2147_v62  ;;  %v2084_v5 = vadd.f32 %v2650_v3, %v3374_v8  ;;  %v2148_v6 = vadd.f32 %v2714_v4, %v3374_v8  ;;  %v1311_v7 = vpop.f32.mrb[47].mxu0  ;;  %v1567_v9 = vpop.f32.mrb[47].mxu1 }
 0x1bf   : > { %2209 = vst [vmem:[%s3380_s22 + $0x160] sm:$0xff] %v2081_v1  ;;  %2273 = vst [vmem:[%s3380_s22 + $0x360] sm:$0xff] %v2145_v2  ;;  %v2082_v10 = vadd.f32 %v3374_v8, %v1311_v7  ;;  %v2146_v11 = vadd.f32 %v3374_v8, %v1567_v9 }
 0x1c0   : > { %2212 = vst [vmem:[%s3380_s22 + $0x178] sm:$0xff] %v2084_v5  ;;  %2276 = vst [vmem:[%s3380_s22 + $0x378] sm:$0xff] %v2148_v6 }
 0x1c1   : > { %2210 = vst [vmem:[%s3380_s22 + $0x168] sm:$0xff] %v2082_v10  ;;  %2274 = vst [vmem:[%s3380_s22 + $0x368] sm:$0xff] %v2146_v11 }
 0x1c3   : > { %v2653_v12 = vpop.f32.mrb[48].mxu0  ;;  %v2717_v13 = vpop.f32.mrb[48].mxu1 }
 0x1c4   : > { %v2087_v14 = vadd.f32 %v2653_v12, %v3374_v8  ;;  %v2151_v15 = vadd.f32 %v2717_v13, %v3374_v8  ;;  %v1324_v16 = vpop.f32.mrb[49].mxu0  ;;  %v1580_v17 = vpop.f32.mrb[49].mxu1 }
 0x1c5   : > { %v2085_v18 = vadd.f32 %v3374_v8, %v1324_v16  ;;  %v2149_v19 = vadd.f32 %v3374_v8, %v1580_v17  ;;  %v2654_v20 = vpop.f32.mrb[50].mxu0  ;;  %v2718_v21 = vpop.f32.mrb[50].mxu1 }
 0x1c6   : > { %2215 = vst [vmem:[%s3380_s22 + $0x190] sm:$0xff] %v2087_v14  ;;  %2279 = vst [vmem:[%s3380_s22 + $0x390] sm:$0xff] %v2151_v15  ;;  %v2088_v22 = vadd.f32 %v2654_v20, %v3374_v8  ;;  %v2152_v23 = vadd.f32 %v2718_v21, %v3374_v8  ;;  %v1327_v24 = vpop.f32.mrb[51].mxu0  ;;  %v1583_v25 = vpop.f32.mrb[51].mxu1 }
 0x1c7   : > { %2213 = vst [vmem:[%s3380_s22 + $0x180] sm:$0xff] %v2085_v18  ;;  %2277 = vst [vmem:[%s3380_s22 + $0x380] sm:$0xff] %v2149_v19  ;;  %v2086_v26 = vadd.f32 %v3374_v8, %v1327_v24  ;;  %v2150_v27 = vadd.f32 %v3374_v8, %v1583_v25 }
 0x1c8   : > { %2216 = vst [vmem:[%s3380_s22 + $0x198] sm:$0xff] %v2088_v22  ;;  %2280 = vst [vmem:[%s3380_s22 + $0x398] sm:$0xff] %v2152_v23 }
 0x1c9   : > { %2214 = vst [vmem:[%s3380_s22 + $0x188] sm:$0xff] %v2086_v26  ;;  %2278 = vst [vmem:[%s3380_s22 + $0x388] sm:$0xff] %v2150_v27 }
 0x1cb   : > { %v2657_v28 = vpop.f32.mrb[52].mxu0  ;;  %v2721_v29 = vpop.f32.mrb[52].mxu1 }
 0x1cc   : > { %v2091_v30 = vadd.f32 %v2657_v28, %v3374_v8  ;;  %v2155_v31 = vadd.f32 %v2721_v29, %v3374_v8  ;;  %v1340_v32 = vpop.f32.mrb[53].mxu0  ;;  %v1596_v33 = vpop.f32.mrb[53].mxu1 }
 0x1cd   : > { %v2089_v34 = vadd.f32 %v3374_v8, %v1340_v32  ;;  %v2153_v35 = vadd.f32 %v3374_v8, %v1596_v33  ;;  %v2658_v36 = vpop.f32.mrb[54].mxu0  ;;  %v2722_v37 = vpop.f32.mrb[54].mxu1 }
 0x1ce   : > { %2219 = vst [vmem:[%s3380_s22 + $0x1b0] sm:$0xff] %v2091_v30  ;;  %2283 = vst [vmem:[%s3380_s22 + $0x3b0] sm:$0xff] %v2155_v31  ;;  %v2092_v38 = vadd.f32 %v2658_v36, %v3374_v8  ;;  %v2156_v39 = vadd.f32 %v2722_v37, %v3374_v8  ;;  %v1343_v40 = vpop.f32.mrb[55].mxu0  ;;  %v1599_v41 = vpop.f32.mrb[55].mxu1 }
 0x1cf   : > { %2217 = vst [vmem:[%s3380_s22 + $0x1a0] sm:$0xff] %v2089_v34  ;;  %2281 = vst [vmem:[%s3380_s22 + $0x3a0] sm:$0xff] %v2153_v35  ;;  %v2090_v42 = vadd.f32 %v3374_v8, %v1343_v40  ;;  %v2154_v43 = vadd.f32 %v3374_v8, %v1599_v41 }
 0x1d0   : > { %2220 = vst [vmem:[%s3380_s22 + $0x1b8] sm:$0xff] %v2092_v38  ;;  %2284 = vst [vmem:[%s3380_s22 + $0x3b8] sm:$0xff] %v2156_v39 }
 0x1d1   : > { %2218 = vst [vmem:[%s3380_s22 + $0x1a8] sm:$0xff] %v2090_v42  ;;  %2282 = vst [vmem:[%s3380_s22 + $0x3a8] sm:$0xff] %v2154_v43 }
 0x1d3   : > { %v2661_v44 = vpop.f32.mrb[56].mxu0  ;;  %v2725_v45 = vpop.f32.mrb[56].mxu1 }
 0x1d4   : > { %v2095_v46 = vadd.f32 %v2661_v44, %v3374_v8  ;;  %v2159_v47 = vadd.f32 %v2725_v45, %v3374_v8  ;;  %v1356_v48 = vpop.f32.mrb[57].mxu0  ;;  %v1612_v49 = vpop.f32.mrb[57].mxu1 }
 0x1d5   : > { %v2093_v50 = vadd.f32 %v3374_v8, %v1356_v48  ;;  %v2157_v51 = vadd.f32 %v3374_v8, %v1612_v49  ;;  %v2662_v52 = vpop.f32.mrb[58].mxu0  ;;  %v2726_v53 = vpop.f32.mrb[58].mxu1 }
 0x1d6   : > { %2223 = vst [vmem:[%s3380_s22 + $0x1d0] sm:$0xff] %v2095_v46  ;;  %2287 = vst [vmem:[%s3380_s22 + $0x3d0] sm:$0xff] %v2159_v47  ;;  %v2096_v54 = vadd.f32 %v2662_v52, %v3374_v8  ;;  %v2160_v55 = vadd.f32 %v2726_v53, %v3374_v8  ;;  %v1359_v56 = vpop.f32.mrb[59].mxu0  ;;  %v1615_v57 = vpop.f32.mrb[59].mxu1 }
 0x1d7   : > { %2221 = vst [vmem:[%s3380_s22 + $0x1c0] sm:$0xff] %v2093_v50  ;;  %2285 = vst [vmem:[%s3380_s22 + $0x3c0] sm:$0xff] %v2157_v51  ;;  %v2094_v58 = vadd.f32 %v3374_v8, %v1359_v56  ;;  %v2158_v59 = vadd.f32 %v3374_v8, %v1615_v57 }
 0x1d8   : > { %2224 = vst [vmem:[%s3380_s22 + $0x1d8] sm:$0xff] %v2096_v54  ;;  %2288 = vst [vmem:[%s3380_s22 + $0x3d8] sm:$0xff] %v2160_v55 }
 0x1d9   : > { %2222 = vst [vmem:[%s3380_s22 + $0x1c8] sm:$0xff] %v2094_v58  ;;  %2286 = vst [vmem:[%s3380_s22 + $0x3c8] sm:$0xff] %v2158_v59 }
 0x1db   : > { %v2665_v60 = vpop.f32.mrb[60].mxu0  ;;  %v2729_v61 = vpop.f32.mrb[60].mxu1 }
 0x1dc   : > { %v2099_v62 = vadd.f32 %v2665_v60, %v3374_v8  ;;  %v2163_v63 = vadd.f32 %v2729_v61, %v3374_v8  ;;  %v1372_v0 = vpop.f32.mrb[61].mxu0  ;;  %v1628_v1 = vpop.f32.mrb[61].mxu1 }
 0x1dd   : > { %v2097_v2 = vadd.f32 %v3374_v8, %v1372_v0  ;;  %v2161_v3 = vadd.f32 %v3374_v8, %v1628_v1  ;;  %v2666_v4 = vpop.f32.mrb[62].mxu0  ;;  %v2730_v5 = vpop.f32.mrb[62].mxu1 }
 0x1de   : > { %2227 = vst [vmem:[%s3380_s22 + $0x1f0] sm:$0xff] %v2099_v62  ;;  %2291 = vst [vmem:[%s3380_s22 + $0x3f0] sm:$0xff] %v2163_v63  ;;  %v2100_v6 = vadd.f32 %v2666_v4, %v3374_v8  ;;  %v2164_v7 = vadd.f32 %v2730_v5, %v3374_v8  ;;  %v1375_v9 = vpop.f32.mrb[63].mxu0  ;;  %v1631_v10 = vpop.f32.mrb[63].mxu1 }
 0x1df   : > { %2225 = vst [vmem:[%s3380_s22 + $0x1e0] sm:$0xff] %v2097_v2  ;;  %2289 = vst [vmem:[%s3380_s22 + $0x3e0] sm:$0xff] %v2161_v3  ;;  %v2098_v11 = vadd.f32 %v3374_v8, %v1375_v9  ;;  %v2162_v12 = vadd.f32 %v3374_v8, %v1631_v10 }
 0x1e0   : > { %2228 = vst [vmem:[%s3380_s22 + $0x1f8] sm:$0xff] %v2100_v6  ;;  %2292 = vst [vmem:[%s3380_s22 + $0x3f8] sm:$0xff] %v2164_v7 }
 0x1e1   : > { %2226 = vst [vmem:[%s3380_s22 + $0x1e8] sm:$0xff] %v2098_v11  ;;  %2290 = vst [vmem:[%s3380_s22 + $0x3e8] sm:$0xff] %v2162_v12 }
 0x1e2   : > { %3005 = shalt.err (!%p3002_p5)
}
 0x1e3   : > { %s3006_s30 = scalar_lea.hbm %s3631_s26, 16384  ;;  %s3010_s7 = scalar_lea.hbm %s3692_s3, 65536 }
 0x1e4   : > { %p3007_p9 = scmp.ne.s32.totalorder %s3631_s26, %s3006_s30  ;;  %p3011_p3 = scmp.lt.u32.totalorder %s3631_s26, %s3692_s3 }
 0x1e5   : > { %p3012_p7 = scmp.lt.u32.totalorder %s3010_s7, %s3006_s30  ;;  %p3014_p2 = scmp.lt.u32.totalorder %s3006_s30, %s3631_s26 }
 0x1e6   : > { %p3008_p12 = pnand %p3007_p9, %p3237_p11 }
 0x1e7   : > { %p3013_p10 = por %p3012_p7, %p3011_p3 }
 0x1e8   : > { %p3009_p1 = pneg %p3008_p12 }
 0x1e9   : > { %p3015_p4 = por %p3014_p2, %p3013_p10 }
 0x1eb   : > { %p3016_p6 = pnand %p3015_p4, %p3009_p1 }
 0x1ed   : > { %3019 = shalt.err (!%p3016_p6)
}
 0x1ee   : > { %s3086_s22 = smov 128   ;;  %s3087_s24 = smov 8  }
 0x1ef   : > { %2757 = dma.vmem_to_hbm [thread:$0]  (%p3237_p11), %s3633_s11, 16384, %s3631_s26, %s2294_s9, %s3086_s22, %s3086_s22, %s3087_s24  }
 0x1f0 PF: > { %p2779_p8 = scmp.ge.s32.totalorder %s3078_s17, 2  ;;  %s2323_s15 = sand.u32 1, %s3058_s12  }
 0x1f1   : > { %p3709_p13 = scmp.ne.s32.totalorder %s3700_s23, 0  ;;  %s2324_s18 = scalar_lea.sflag [#allocation5], %s2323_s15 }
 0x1f3   : > { %p2771_p0 = pnand %p2779_p8, %p3709_p13 }
 0x1f5   : > { %3053 = dma.done.wait (!%p2771_p0), %s2324_s18, 16384  }
 0x1f6   : > { %3055 = vsyncadd (!%p2771_p0), %s2324_s18, 4294950912  ;;  %s20_s17 = sadd.s32 1, %s3078_s17   ;;  %s3710_s12 = smov %s3062_s13 }
 0x1f7   : > { %p17_p5 = scmp.ge.s32.totalorder %s20_s17, 6   ;;  %s3711_s13 = smov %s3066_s14 }
 0x1f8   : > { %s3712_s14 = smov %s3246_s6  ;;  %s3713_s15 = smov %s3074_s16 }
 0x1f9   : > { %s3714_s16 = smov %s3716_s25  ;;  %19 = sbr.rel (!%p17_p5) target bundleno = 7 (0x7), region = 95 }
 0x200   :  { %2329 = vsyncpa [#allocation4], 1 }
 0x201   :  { %2331 = vsyncpa [#allocation4 + $0x1], 1 }
 0x202   :  { %2332 = vsyncpa [#allocation7], 1 }
 0x203   :  { %2333 = vsyncpa [#allocation5], 1 }
 0x204   :  { %2335 = vsyncpa [#allocation5 + $0x1], 1 }

</bundles_post_ra>
